<compile_context>
chip_gen: v6e
topology: v6e:2x2x1
jax: 0.10.0
libtpu: 0.0.40
codegen_flags: <defaults>
</compile_context>

<pallas_src>
import functools

import jax
import jax.numpy as jnp
from jax.experimental import pallas as pl
from jax.experimental.pallas import tpu as pltpu


_LEAKY_SLOPE = 0.01                      # F.leaky_relu default negative_slope
_LANE = 128                              # TPU vreg lane width
_HIGHEST = jax.lax.Precision.HIGHEST


def _leaky_relu(z):
    return jnp.where(z > 0, z, _LEAKY_SLOPE * z)


def _softplus(u):
    return jnp.maximum(u, 0.0) + jnp.log1p(jnp.exp(-jnp.abs(u)))


def _meta(layer_sizes):
    """Static packing layout derived from layer_sizes."""
    ls = [int(l) for l in layer_sizes]
    assert len(ls) >= 3, "PosDefICNN needs at least one U matrix"
    n0 = ls[0]
    outs = ls[1:]                        # output width of each of the L layers
    L = len(outs)
    out_dim = outs[-1]
    w_total = sum(outs)
    w_off, o = [], 0
    for v in outs:
        w_off.append(o)
        o += v
    # U[j] has shape (ls[j+2], ls[j+1]) for j = 0 .. L-2
    u_off, r = [], 0
    for j in range(L - 1):
        u_off.append(r)
        r += ls[j + 2]
    return dict(ls=ls, n0=n0, outs=outs, n_layers=L, out_dim=out_dim,
                w_total=w_total, w_off=w_off, u_off=u_off,
                u_rows=r, u_cols=max(ls[1:L]))


def pack_params(layer_sizes, Ws, Us, bs, goal, eps, negative_slope):
    """Pack all parameters for the transposed (batch-on-lanes) problem.

    p1 : (w_total, n0 + 1).  Columns 0:n0 hold the stacked W_i rows (the last
         layer's rows also absorb the quadratic cross term -2*eps*goal);
         column n0 holds the effective bias  scale_i * b_i - W_i @ goal
         (+ eps*||goal||^2 for the last layer), scale = [1, ns, ..., ns, 1].
    p2 : (u_rows, u_cols) row-stacked softplus(U_j); middle-layer blocks are
         pre-scaled by negative_slope, the final block is unscaled.
    """
    m = _meta(layer_sizes)
    n0, L = m["n0"], m["n_layers"]
    ns = float(negative_slope)
    eps = float(eps)
    goal = goal.astype(jnp.float32).reshape(-1)
    goal_sq = jnp.dot(goal, goal, precision=_HIGHEST)

    w_blocks, b_blocks = [], []
    for i, (W, b) in enumerate(zip(Ws, bs)):
        W = W.astype(jnp.float32)
        b = b.astype(jnp.float32).reshape(-1)
        w_goal = jnp.dot(W, goal, precision=_HIGHEST)
        if i == 0:
            w_eff, b_eff = W, b - w_goal
        elif i < L - 1:
            w_eff, b_eff = W, ns * b - w_goal
        else:                                      # last layer absorbs eps*||x-goal||^2 cross terms
            w_eff = W - 2.0 * eps * goal[None, :]
            b_eff = b - w_goal + eps * goal_sq
        w_blocks.append(w_eff)
        b_blocks.append(b_eff)
    p1 = jnp.concatenate(
        [jnp.concatenate(w_blocks, axis=0),
         jnp.concatenate(b_blocks, axis=0)[:, None]], axis=1)     # (w_total, n0+1)

    p2 = jnp.zeros((m["u_rows"], m["u_cols"]), jnp.float32)
    for j, U in enumerate(Us):
        u = _softplus(U.astype(jnp.float32))
        if j < len(Us) - 1:
            u = ns * u                             # negative_slope pre-folded for middle layers
        r = m["u_off"][j]
        p2 = p2.at[r:r + u.shape[0], :u.shape[1]].set(u)
    return p1, p2


def _make_kernel(meta, eps):
    ls = meta["ls"]
    n0, outs = meta["n0"], meta["outs"]
    L, out_dim = meta["n_layers"], meta["out_dim"]
    w_off, u_off = meta["w_off"], meta["u_off"]
    eps = float(eps)

    def kernel(x_ref, p1_ref, p2_ref, o_ref):
        x = x_ref[...]                                    # (n0, TB)   batch on lanes
        p1 = p1_ref[...]                                  # (w_total, n0+1)
        p2 = p2_ref[...]                                  # (u_rows, u_cols)

        # One fused MXU matmul covering every W_i @ x; goal and biases are
        # folded into column n0 of the slab at pack time.
        dwb = jnp.dot(p1[:, :n0], x, precision=_HIGHEST,
                      preferred_element_type=jnp.float32) + p1[:, n0:n0 + 1]

        z = _leaky_relu(dwb[w_off[0]:w_off[0] + outs[0], :])
        for j in range(1, L - 1):                         # middle ICNN layers
            u = p2[u_off[j - 1]:u_off[j - 1] + outs[j], :ls[j]]   # ns * softplus(U)
            z = _leaky_relu(dwb[w_off[j]:w_off[j] + outs[j], :]
                            + jnp.dot(u, z, precision=_HIGHEST,
                                      preferred_element_type=jnp.float32))

        u_last = p2[u_off[L - 2]:u_off[L - 2] + out_dim, :ls[L - 1]]
        quad = eps * jnp.sum(x * x, axis=0, keepdims=True)        # only eps*||x||^2 left in-kernel
        o_ref[...] = (dwb[w_off[L - 1]:w_off[L - 1] + out_dim, :]
                      + jnp.dot(u_last, z, precision=_HIGHEST,
                                preferred_element_type=jnp.float32)
                      + quad)                             # compact (out_dim, TB) store

    return kernel


def pos_def_icnn_forward(x, p1, p2, *, layer_sizes, eps, block_lanes=8192):
    """Batched Pallas forward: x (B, n0) -> (B, out_dim)."""
    meta = _meta(layer_sizes)
    n0, out_dim = meta["n0"], meta["out_dim"]
    ls = meta["ls"]
    B = x.shape[0]

    xt = x.astype(jnp.float32).T                          # (n0, B): batch on the lane axis

    b_ceil = max(_LANE, pl.cdiv(B, _LANE) * _LANE)
    tb = max(_LANE, (min(int(block_lanes), b_ceil) // _LANE) * _LANE)
    # Keep >= 2 blocks whenever the batch allows it so the "parallel" axis can
    # split across both TensorCores on v7x (single-TC chips lose only ~0.35us).
    if b_ceil >= 2 * _LANE and pl.cdiv(B, tb) < 2:
        tb = max(_LANE, pl.cdiv(b_ceil // 2, _LANE) * _LANE)
    n_blocks = pl.cdiv(B, tb)                             # ragged final block is fine

    kernel = _make_kernel(meta, eps)

    flops_per_col = 2 * n0 * meta["w_total"]
    for j in range(1, meta["n_layers"] - 1):
        flops_per_col += 2 * ls[j] * meta["outs"][j]
    flops_per_col += 2 * ls[-2] * out_dim + 4 * n0 + 4 * meta["w_total"]
    cost = pl.CostEstimate(
        flops=int(flops_per_col) * int(n_blocks * tb),
        transcendentals=0,                                # softplus pre-applied at pack time
        bytes_accessed=4 * int(xt.size + p1.size + p2.size + out_dim * B),
    )

    out = pl.pallas_call(
        kernel,
        out_shape=jax.ShapeDtypeStruct((out_dim, B), jnp.float32),
        grid_spec=pltpu.PrefetchScalarGridSpec(
            num_scalar_prefetch=0,
            grid=(n_blocks,),
            in_specs=[
                pl.BlockSpec((n0, tb), lambda i: (0, i)),        # batch-lane tiles of x
                pl.BlockSpec(p1.shape, lambda i: (0, 0)),        # grid-invariant param slab
                pl.BlockSpec(p2.shape, lambda i: (0, 0)),        # grid-invariant param slab
            ],
            out_specs=pl.BlockSpec((out_dim, tb), lambda i: (0, i)),  # compact lane-dense out
        ),
        compiler_params=pltpu.CompilerParams(
            dimension_semantics=("parallel",)),                   # megacore on v7x
        cost_estimate=cost,
    )(xt, p1, p2)

    return out.T                                          # (B, out_dim)


# ----------------------------------------------------------------------------
# Reference / init helpers (pure JAX) for correctness checking.
# ----------------------------------------------------------------------------
def init_params(key, layer_sizes):
    """Deterministic init matching reset_parameters (kaiming_uniform_, a=sqrt(5))."""
    n0 = layer_sizes[0]
    Ws, Us, bs = [], [], []
    keys = jax.random.split(key, 2 * len(layer_sizes))
    ki = 0
    for l in layer_sizes[1:]:
        bound = 1.0 / (n0 ** 0.5)
        Ws.append(jax.random.uniform(keys[ki], (l, n0), jnp.float32, -bound, bound))
        ki += 1
    for i in range(1, len(layer_sizes) - 1):
        bound = 1.0 / (layer_sizes[i] ** 0.5)
        Us.append(jax.random.uniform(
            keys[ki], (layer_sizes[i + 1], layer_sizes[i]), jnp.float32, -bound, bound))
        ki += 1
    for l in layer_sizes[1:]:
        bs.append(jnp.zeros((l,), jnp.float32))
    return Ws, Us, bs


def reference_forward(x, goal, Ws, Us, bs, eps, negative_slope):
    """Pure-JAX transcription of PosDefICNN.forward (f32, HIGHEST matmul precision)."""
    d = x - goal[None, :]
    z = _leaky_relu(jnp.dot(d, Ws[0].T, precision=_HIGHEST) + bs[0][None, :])
    for W, b, U in zip(Ws[1:-1], bs[1:-1], Us[:-1]):
        z = (jnp.dot(d, W.T, precision=_HIGHEST)
             + (jnp.dot(z, _softplus(U).T, precision=_HIGHEST) + b[None, :]) * negative_slope)
        z = _leaky_relu(z)
    z = (jnp.dot(d, Ws[-1].T, precision=_HIGHEST)
         + jnp.dot(z, _softplus(Us[-1]).T, precision=_HIGHEST) + bs[-1][None, :])
    return z + eps * jnp.sum(d * d, axis=1, keepdims=True)


if __name__ == "__main__":
    layer_sizes = [4, 32, 32, 1]
    eps = 0.01
    negative_slope = 0.1
    B = 1024    # -> two 512-lane tiles: exercises the parallel grid / v7x megacore split

    key = jax.random.PRNGKey(0)
    k_x, k_goal, k_params = jax.random.split(key, 3)

    x = jax.random.normal(k_x, (B, layer_sizes[0]), jnp.float32)
    goal = jax.random.normal(k_goal, (layer_sizes[0],), jnp.float32)
    Ws, Us, bs = init_params(k_params, layer_sizes)

    # Parameters are packed / transposed / softplus'd / goal-folded once, outside the kernel.
    p1, p2 = pack_params(layer_sizes, Ws, Us, bs, goal, eps, negative_slope)

    fwd = jax.jit(functools.partial(
        pos_def_icnn_forward,
        layer_sizes=tuple(layer_sizes), eps=eps, block_lanes=8192))

    out = jax.block_until_ready(fwd(x, p1, p2))

    ref = reference_forward(x, goal, Ws, Us, bs, eps, negative_slope)
    assert out.shape == (B, layer_sizes[-1]), out.shape
    # Goal folding is algebraically exact; the tolerance covers f32 re-association
    # between the fused slab layout and the layer-by-layer reference (and any
    # residual TPU matmul-pass rounding).
    err = float(jnp.max(jnp.abs(out - ref)))
    assert jnp.allclose(out, ref, atol=2e-3, rtol=2e-3), err

    print("KERNEL_OK")
</pallas_src>

<mosaic_0001>
module attributes {stable_mosaic.version = 11 : i64} {
  func.func @kernel(%arg0: i32, %arg1: memref<4x512xf32, #tpu.memory_space<vmem>>, %arg2: memref<65x5xf32, #tpu.memory_space<vmem>>, %arg3: memref<33x32xf32, #tpu.memory_space<vmem>>, %arg4: memref<1x512xf32, #tpu.memory_space<vmem>>) attributes {dimension_semantics = [#tpu.dimension_semantics<parallel>], iteration_bounds = array<i64: 2>, scalar_prefetch = 0 : i64, scratch_operands = 0 : i64, tpu.core_type = #tpu.core_type<tc>, window_params = [{transform_indices = @transform_0, window_bounds = array<i64: 4, 512>}, {pipeline_mode = #tpu.pipeline_mode<synchronous>, transform_indices = @transform_1, window_bounds = array<i64: 65, 5>}, {pipeline_mode = #tpu.pipeline_mode<synchronous>, transform_indices = @transform_2, window_bounds = array<i64: 33, 32>}, {transform_indices = @transform_3, window_bounds = array<i64: 1, 512>}]} {
    %c0 = arith.constant 0 : index
    %c0_0 = arith.constant 0 : index
    %0 = vector.load %arg1[%c0, %c0_0] : memref<4x512xf32, #tpu.memory_space<vmem>>, vector<4x512xf32>
    %c0_1 = arith.constant 0 : index
    %c0_2 = arith.constant 0 : index
    %1 = vector.load %arg2[%c0_1, %c0_2] : memref<65x5xf32, #tpu.memory_space<vmem>>, vector<65x5xf32>
    %c0_3 = arith.constant 0 : index
    %c0_4 = arith.constant 0 : index
    %2 = vector.load %arg3[%c0_3, %c0_4] : memref<33x32xf32, #tpu.memory_space<vmem>>, vector<33x32xf32>
    %3 = vector.extract_strided_slice %1 {offsets = [0, 0], sizes = [65, 4], strides = [1, 1]} : vector<65x5xf32> to vector<65x4xf32>
    %cst = arith.constant dense<0.000000e+00> : vector<65x512xf32>
    %4 = tpu.matmul %3, %0, %cst {dimension_numbers = #tpu.dot_dimension_numbers<[1], [0], [0], [1], [0, 0, 1, 1], [], []>, precision = #tpu.contract_precision<fp32>} : vector<65x4xf32>, vector<4x512xf32>, vector<65x512xf32> -> vector<65x512xf32>
    %5 = vector.extract_strided_slice %1 {offsets = [0, 4], sizes = [65, 1], strides = [1, 1]} : vector<65x5xf32> to vector<65x1xf32>
    %6 = vector.broadcast %5 : vector<65x1xf32> to vector<65x512xf32>
    %7 = arith.addf %4, %6 : vector<65x512xf32>
    %8 = vector.extract_strided_slice %7 {offsets = [0, 0], sizes = [32, 512], strides = [1, 1]} : vector<65x512xf32> to vector<32x512xf32>
    %cst_5 = arith.constant 0.000000e+00 : f32
    %9 = vector.broadcast %cst_5 : f32 to vector<32x512xf32>
    %10 = arith.cmpf ogt, %8, %9 : vector<32x512xf32>
    %cst_6 = arith.constant 0.00999999977 : f32
    %11 = vector.broadcast %cst_6 : f32 to vector<32x512xf32>
    %12 = arith.mulf %11, %8 : vector<32x512xf32>
    %13 = arith.select %10, %8, %12 : vector<32x512xi1>, vector<32x512xf32>
    %14 = vector.extract_strided_slice %2 {offsets = [0, 0], sizes = [32, 32], strides = [1, 1]} : vector<33x32xf32> to vector<32x32xf32>
    %15 = vector.extract_strided_slice %7 {offsets = [32, 0], sizes = [32, 512], strides = [1, 1]} : vector<65x512xf32> to vector<32x512xf32>
    %cst_7 = arith.constant dense<0.000000e+00> : vector<32x512xf32>
    %16 = tpu.matmul %14, %13, %cst_7 {dimension_numbers = #tpu.dot_dimension_numbers<[1], [0], [0], [1], [0, 0, 1, 1], [], []>, precision = #tpu.contract_precision<fp32>} : vector<32x32xf32>, vector<32x512xf32>, vector<32x512xf32> -> vector<32x512xf32>
    %17 = arith.addf %15, %16 : vector<32x512xf32>
    %cst_8 = arith.constant 0.000000e+00 : f32
    %18 = vector.broadcast %cst_8 : f32 to vector<32x512xf32>
    %19 = arith.cmpf ogt, %17, %18 : vector<32x512xf32>
    %cst_9 = arith.constant 0.00999999977 : f32
    %20 = vector.broadcast %cst_9 : f32 to vector<32x512xf32>
    %21 = arith.mulf %20, %17 : vector<32x512xf32>
    %22 = arith.select %19, %17, %21 : vector<32x512xi1>, vector<32x512xf32>
    %23 = vector.extract_strided_slice %2 {offsets = [32, 0], sizes = [1, 32], strides = [1, 1]} : vector<33x32xf32> to vector<1x32xf32>
    %24 = arith.mulf %0, %0 : vector<4x512xf32>
    %cst_10 = arith.constant dense<0.000000e+00> : vector<512xf32>
    %25 = vector.multi_reduction <add>, %24, %cst_10 [0] : vector<4x512xf32> to vector<512xf32>
    %26 = vector.shape_cast %25 : vector<512xf32> to vector<1x512xf32>
    %cst_11 = arith.constant 0.00999999977 : f32
    %27 = vector.broadcast %cst_11 : f32 to vector<1x512xf32>
    %28 = arith.mulf %27, %26 : vector<1x512xf32>
    %29 = vector.extract_strided_slice %7 {offsets = [64, 0], sizes = [1, 512], strides = [1, 1]} : vector<65x512xf32> to vector<1x512xf32>
    %cst_12 = arith.constant dense<0.000000e+00> : vector<1x512xf32>
    %30 = tpu.matmul %23, %22, %cst_12 {dimension_numbers = #tpu.dot_dimension_numbers<[1], [0], [0], [1], [0, 0, 1, 1], [], []>, precision = #tpu.contract_precision<fp32>} : vector<1x32xf32>, vector<32x512xf32>, vector<1x512xf32> -> vector<1x512xf32>
    %31 = arith.addf %29, %30 : vector<1x512xf32>
    %32 = arith.addf %31, %28 : vector<1x512xf32>
    %c0_13 = arith.constant 0 : index
    %c0_14 = arith.constant 0 : index
    %33 = vector.load %arg4[%c0_13, %c0_14] : memref<1x512xf32, #tpu.memory_space<vmem>>, vector<1x512xf32>
    tpu.vector_store %arg4[%c0_13, %c0_14], %32 {strides = array<i32>} : memref<1x512xf32, #tpu.memory_space<vmem>>, vector<1x512xf32>,
    return
  }
  func.func @transform_0(%arg0: i32) -> (i32, i32) {
    %c0_i32 = arith.constant 0 : i32
    %c0_i32_0 = arith.constant 0 : i32
    return %c0_i32, %arg0 : i32, i32
  }
  func.func @transform_1(%arg0: i32) -> (i32, i32) {
    %c0_i32 = arith.constant 0 : i32
    %c0_i32_0 = arith.constant 0 : i32
    %c0_i32_1 = arith.constant 0 : i32
    return %c0_i32, %c0_i32_0 : i32, i32
  }
  func.func @transform_2(%arg0: i32) -> (i32, i32) {
    %c0_i32 = arith.constant 0 : i32
    %c0_i32_0 = arith.constant 0 : i32
    %c0_i32_1 = arith.constant 0 : i32
    return %c0_i32, %c0_i32_0 : i32, i32
  }
  func.func @transform_3(%arg0: i32) -> (i32, i32) {
    %c0_i32 = arith.constant 0 : i32
    %c0_i32_0 = arith.constant 0 : i32
    return %c0_i32, %arg0 : i32, i32
  }
}

</mosaic_0001>

<bundles_post_ra>
// kernel: pos_def_icnn_forward.1
= control target key start
LH: loop header
LB: loop body
LE: loop exit
PB: predicated region body
PF: predicated region fallthrough
CT: control target
= control target key end

     0   :  { %8 = vsyncpa [#allocation3], 0  ;;  %s6427_s0 = inlined_call_operand.vmem [shape: f32[4,1024], index: 0, kind: input, shape index: {}]   ;;  %s6428_s1 = inlined_call_operand.vmem [shape: f32[65,5], index: 1, kind: input, shape index: {}]   ;;  %s6429_s2 = inlined_call_operand.vmem [shape: f32[33,32], index: 2, kind: input, shape index: {}]   ;;  %s6430_s3 = inlined_call_operand.hbm [shape: f32[1,1024], index: 3, kind: output, shape index: {}]  }
   0x1   :  { %10 = vsyncpa [#allocation3 + $0x1], 0  ;;  %s4876_s12 = smov 0   ;;  %s4878_s13 = smov 0  }
   0x2   :  { %s4880_s14 = smov 0   ;;  %s4882_s15 = smov 0  }
   0x3 LB: > { %s4897_s16 = sadd.s32 4294967295, %s4850_s15   ;;  %s4729_s17 = sadd.s32 4294967294, %s4850_s15   ;;  %s4850_s15 = sphi %s4882_s15, %s6575_s15   ;;  %s4846_s14 = sphi %s4880_s14, %s6574_s14   ;;  %s4842_s13 = sphi %s4878_s13, %s6573_s13   ;;  %s4838_s12 = sphi %s4876_s12, %s6572_s12  }
   0x4   : > { %s4901_s18 = sadd.s32 1, %s4850_s15   ;;  %s91_s19 = sadd.s32 1, %s4846_s14 }
   0x5   : > { %s88_s20 = ssub.s32 %s4850_s15, %s4901_s18  ;;  %p101_p0 = scmp.ne.s32.totalorder %s4846_s14, %s4842_s13 }
   0x6   : > { %p89_p1 = scmp.eq.s32.totalorder %s88_s20, 0  ;;  %p102_p2 = scmp.eq.s32.totalorder %s4897_s16, 1 }
   0x7   : > { %p107_p3 = scmp.ne.s32.totalorder %s4842_s13, %s4838_s12  ;;  %p108_p4 = scmp.eq.s32.totalorder %s4729_s17, 1 }
   0x8   : > { %s4912_s21 = scalar_select %p89_p1, %s4846_s14, %s91_s19  }
   0x9   : > { %p4914_p5 = por %p102_p2, %p101_p0  ;;  %p4918_p6 = por %p108_p4, %p107_p3 }
   0xa   : > { %p4732_p7 = scmp.ge.s32.totalorder %s4850_s15, 1  ;;  %p141_p8 = scmp.lt.s32.totalorder %s4850_s15, 3 }
   0xc   : > { %p142_p9 = pnand %p4732_p7, %p141_p8 }
   0xe   : > { %145 = sbr.rel (%p142_p9) target bundleno = 961 (0x3c1), region = 32 }
  0x13   : > { %s4734_s24 = sshll.u32 %s4897_s16, 2  ;;  %v4928_v0 = vld [vmem:[%s6428_s1] sm:$0xff]  ;;  %vm237_vm0 = vcmask 31744   ;;  %v175_v1 = vld [vmem:[%s6428_s1 + $0x8] sm:$0xff]  ;;  %v6431_v2 = vmov 0.0   ;;  %v4941_v5 = vld [vmem:[%s6428_s1 + $0x10] sm:$0xff] }
  0x14   : > { %p166_p10 = scmp.lt.s32.totalorder %s4734_s24, 7  ;;  %331 = vmatprep.mubr.f32.mxu0 %v6431_v2  ;;  %v238_v3 = vsel %vm237_vm0, %v4928_v0, 0  ;;  %v240_v4 = vsel %vm237_vm0, %v175_v1, 0  ;;  %505 = vmatprep.mubr.f32.mxu1 %v6431_v2  ;;  %v4946_v6 = vld [vmem:[%s6428_s1 + $0x18] sm:$0xff]  ;;  %v242_v9 = vsel %vm237_vm0, %v4941_v5, 0  ;;  %v4967_v14 = vld [vmem:[%s6428_s1 + $0x20] sm:$0xff] }
  0x15   : > { %v4948_v7 = vand.u32 4294901760, %v238_v3  ;;  %v4950_v8 = vand.u32 4294901760, %v240_v4  ;;  %v4954_v10 = vand.u32 4294901760, %v242_v9  ;;  %v244_v11 = vsel %vm237_vm0, %v4946_v6, 0  ;;  %v4985_v18 = vld [vmem:[%s6428_s1 + $0x28] sm:$0xff]  ;;  %v180_v35 = vld [vmem:[%s6428_s1 + $0x30] sm:$0xff] }
  0x16   : > { %s6577_s24 = smov (!%p166_p10, %s4734_s24), 7  ;;  %vm256_vm1 = vcmask 1043456   ;;  %v4980_v17 = vand.u32 4294901760, %v244_v11  ;;  %v246_v21 = vsel %vm237_vm0, %v4967_v14, 0  ;;  %v248_v26 = vsel %vm237_vm0, %v4985_v18, 0  ;;  %v181_v48 = vld [vmem:[%s6428_s1 + $0x38] sm:$0xff] }
  0x17   : > { %v4959_v12 = vsub.f32 %v238_v3, %v4948_v7  ;;  %v4962_v13 = vsub.f32 %v240_v4, %v4950_v8  ;;  %s4735_s8 = sshll.u32 %s6577_s24, 2  ;;  %v4978_v16 = vsub.f32 %v242_v9, %v4954_v10  ;;  %v5007_v30 = vand.u32 4294901760, %v246_v21  ;;  %v182_v57 = vld [vmem:[%s6428_s1 + $0x40] sm:$0x1]  ;;  %s4741_s20 = sshll.u32 %s4897_s16, 6 }
  0x18   : > { %s4972_s11 = scalar_lea.vmem %s6427_s0, %s4735_s8  ;;  %v5005_v29 = vsub.f32 %v244_v11, %v4980_v17  ;;  %v5031_v40 = vand.u32 4294901760, %v248_v26  ;;  %v250_v41 = vsel %vm237_vm0, %v180_v35, 0  ;;  %v4853_v42 = vmov 4   ;;  %s4668_s28 = scalar_lea.hbm %s6430_s3, %s4741_s20 }
  0x19   : > { %v4975_v15 = vand.u32 4294901760, %v4959_v12  ;;  %v172_v19 = vld [vmem:[%s4972_s11] sm:$0xff]  ;;  %v4989_v20 = vand.u32 4294901760, %v4962_v13  ;;  %v5002_v28 = vand.u32 4294901760, %v4978_v16  ;;  %v5029_v39 = vsub.f32 %v246_v21, %v5007_v30  ;;  %4785 = vset.pattern.permute.xlu1 %v4853_v42  ;;  %4784 = vset.pattern.permute.xlu0 %v4853_v42  ;;  %s4855_s4 = smov [#allocation2]  }
  0x1a   : > { %v235_v22 = vcombine.high %v172_v19, %v172_v19  ;;  %v257_v23 = vsel %vm256_vm1, %v172_v19, 0  ;;  %v5026_v38 = vand.u32 4294901760, %v5005_v29  ;;  %195 = vperm.xlu1 %4785, %v175_v1   ;;  %v5048_v50 = vsub.f32 %v248_v26, %v5031_v40  ;;  %205 = vperm.xlu0 %4784, %v4946_v6   ;;  %s4794_s5 = sshll.u32 %s4855_s4, 4  ;;  %s4795_s5 = int_to_ptr.vmem [resolvable:$false] %s4794_s5 }
  0x1b   : > { %v335_v24 = vsub.f32 %v4959_v12, %v4975_v15  ;;  %v4996_v25 = vand.u32 4294901760, %v257_v23  ;;  %v346_v33 = vsub.f32 %v4962_v13, %v4989_v20  ;;  %v357_v46 = vsub.f32 %v4978_v16, %v5002_v28  ;;  %s4796_s16 = scalar_lea.vmem %s4795_s5, 128 }
  0x1c   : > { %v259_v27 = vsel %vm256_vm1, %v235_v22, 0  ;;  %v5050_v51 = vand.u32 4294901760, %v250_v41  ;;  %v368_v54 = vsub.f32 %v5005_v29, %v5026_v38  ;;  %v5058_v55 = vand.u32 4294901760, %v5029_v39 }
  0x1d   : > { %v5009_v31 = vand.u32 4294901760, %v259_v27  ;;  %v5011_v32 = vand.u32 4294901760, %v335_v24  ;;  %v5016_v34 = vsub.f32 %v257_v23, %v4996_v25  ;;  %v5035_v43 = vand.u32 4294901760, %v346_v33 }
  0x1e   : > { %v5053_v53 = vand.u32 4294901760, %v357_v46  ;;  %v252_v56 = vsel %vm237_vm0, %v181_v48, 0  ;;  %190 = vperm.xlu1 %4785, %v4928_v0   ;;  %v5068_v58 = vand.u32 4294901760, %v5048_v50  ;;  %v5072_v59 = vand.u32 4294901760, %v368_v54  ;;  %200 = vperm.xlu0 %4784, %v4941_v5  }
  0x1f   : > { %296 = vmatprep.subr.mxu0 %v5009_v31  ;;  %v462_v36 = vsub.f32 %v259_v27, %v5009_v31  ;;  %v469_v37 = vand.u32 4294901760, %v5016_v34  ;;  %v379_v60 = vsub.f32 %v5029_v39, %v5058_v55  ;;  %v5077_v61 = vsub.f32 %v250_v41, %v5050_v51 }
  0x20   : > { %298 = vmatpush1.msra.mxu0 %v4996_v25  ;;  %v5079_v62 = vand.u32 4294901760, %v252_v56  ;;  %v254_v63 = vsel %vm237_vm0, %v182_v57, 0  ;;  %v390_v0 = vsub.f32 %v5048_v50, %v5068_v58  ;;  %vm2027_vm2 = vcmask 261120  }
  0x21   : > { %337 = vmatmul.mubr.f32.vlgmr.msra.gmra.mxu0 %v5011_v32  ;;  %v463_v44 = vand.u32 4294901760, %v462_v36  ;;  %v470_v45 = vsub.f32 %v5016_v34, %v469_v37  ;;  %601 = vmatprep.subr.mxu0 %v462_v36  ;;  %v5091_v1 = vand.u32 4294901760, %v379_v60  ;;  %v5094_v3 = vand.u32 4294901760, %v5077_v61 }
  0x22   : > { %342 = vmatprep.mubr.f32.mxu0 %v6431_v2  ;;  %604 = vmatpush1.msra.mxu0 %v5016_v34  ;;  %v5097_v4 = vsub.f32 %v252_v56, %v5079_v62  ;;  %v5099_v5 = vand.u32 4294901760, %v254_v63  ;;  %v5107_v6 = vand.u32 4294901760, %v390_v0 }
  0x23   : > { %v464_v47 = vsub.f32 %v462_v36, %v463_v44  ;;  %891 = vmatprep.subr.mxu0 %v463_v44  ;;  %v471_v49 = vand.u32 4294901760, %v470_v45  ;;  %220 = vperm.xlu1 %4785, %v180_v35   ;;  %v401_v9 = vsub.f32 %v5077_v61, %v5094_v3 }
  0x24   : > { %225 = vperm.xlu0 %4784, %v181_v48   ;;  %v5112_v11 = vand.u32 4294901760, %v5097_v4  ;;  %v5115_v19 = vsub.f32 %v254_v63, %v5099_v5 }
  0x25   : > { %348 = vmatmul.mubr.f32.gmra.mxu0 %v5035_v43  ;;  %v465_v52 = vand.u32 4294901760, %v464_v47  ;;  %v5123_v21 = vand.u32 4294901760, %v401_v9 }
  0x26   : > { %353 = vmatprep.mubr.f32.mxu0 %v6431_v2  ;;  %v412_v22 = vsub.f32 %v5097_v4, %v5112_v11  ;;  %v5128_v23 = vand.u32 4294901760, %v5115_v19 }
  0x27   : > { %466 = vmatprep.subr.mxu1 %v465_v52  ;;  %210 = vperm.xlu1 %4785, %v4967_v14   ;;  %v173_v14 = vld [vmem:[%s4972_s11 + $0x8] sm:$0xff] }
  0x28   : > { %472 = vmatpush1.msra.mxu1 %v471_v49  ;;  %215 = vperm.xlu0 %4784, %v4985_v18   ;;  %v236_v24 = vcombine.high %v173_v14, %v173_v14  ;;  %v5134_v18 = vand.u32 4294901760, %v412_v22  ;;  %v423_v26 = vsub.f32 %v5115_v19, %v5128_v23 }
  0x29   : > { %359 = vmatmul.mubr.f32.gmra.mxu0 %v5053_v53  ;;  %507 = vmatmul.mubr.f32.vlgmr.msra.gmra.mxu1 %v4948_v7 }
  0x2a   : > { %364 = vmatprep.mubr.f32.mxu0 %v6431_v2  ;;  %512 = vmatprep.mubr.f32.mxu1 %v6431_v2  ;;  %v263_v27 = vsel %vm256_vm1, %v236_v24, 0  ;;  %v5145_v33 = vand.u32 4294901760, %v423_v26 }
  0x2b   : > { %741 = vmatprep.subr.mxu1 %v5009_v31 }
  0x2c   : > { %743 = vmatpush1.msra.mxu1 %v4996_v25  ;;  %230 = vperm.xlu0 %4784, %v182_v57  }
  0x2d   : > { %370 = vmatmul.mubr.f32.gmra.mxu0 %v5072_v59  ;;  %514 = vmatmul.mubr.f32.gmra.mxu1 %v4950_v8 }
  0x2e   : > { %375 = vmatprep.mubr.f32.mxu0 %v6431_v2  ;;  %519 = vmatprep.mubr.f32.mxu1 %v6431_v2 }
  0x2f   : > { %1023 = vmatprep.subr.mxu1 %v5009_v31  ;;  %v5141_v31 = vand.u32 4294901760, %v263_v27 }
  0x31   : > { %381 = vmatmul.mubr.f32.gmra.mxu0 %v5091_v1  ;;  %521 = vmatmul.mubr.f32.gmra.mxu1 %v4954_v10  ;;  %v5150_v35 = vsub.f32 %v263_v27, %v5141_v31 }
  0x32   : > { %386 = vmatprep.mubr.f32.mxu0 %v6431_v2  ;;  %526 = vmatprep.mubr.f32.mxu1 %v6431_v2 }
  0x33   : > { %v1320_v36 = vand.u32 4294901760, %v5150_v35 }
  0x35   : > { %392 = vmatmul.mubr.f32.gmra.mxu0 %v5107_v6  ;;  %528 = vmatmul.mubr.f32.gmra.mxu1 %v4980_v17  ;;  %v1321_v41 = vsub.f32 %v5150_v35, %v1320_v36 }
  0x36   : > { %397 = vmatprep.mubr.f32.mxu0 %v6431_v2  ;;  %533 = vmatprep.mubr.f32.mxu1 %v6431_v2 }
  0x37   : > { %v1322_v42 = vand.u32 4294901760, %v1321_v41 }
  0x39   : > { %403 = vmatmul.mubr.f32.gmra.mxu0 %v5123_v21  ;;  %535 = vmatmul.mubr.f32.gmra.mxu1 %v5007_v30 }
  0x3a   : > { %408 = vmatprep.mubr.f32.mxu0 %v6431_v2  ;;  %540 = vmatprep.mubr.f32.mxu1 %v6431_v2 }
  0x3d   : > { %414 = vmatmul.mubr.f32.gmra.mxu0 %v5134_v18  ;;  %542 = vmatmul.mubr.f32.gmra.mxu1 %v5031_v40 }
  0x3e   : > { %419 = vmatprep.mubr.f32.mxu0 %v6431_v2  ;;  %547 = vmatprep.mubr.f32.mxu1 %v6431_v2 }
  0x41   : > { %425 = vmatmul.mubr.f32.gmra.mxu0 %v5145_v33  ;;  %549 = vmatmul.mubr.f32.gmra.mxu1 %v5050_v51 }
  0x42   : > { %554 = vmatprep.mubr.f32.mxu1 %v6431_v2  ;;  %637 = vmatprep.mubr.f32.mxu0 %v6431_v2 }
  0x45   : > { %556 = vmatmul.mubr.f32.gmra.mxu1 %v5079_v62  ;;  %640 = vmatmul.mubr.f32.vlgmr.msra.gmra.mxu0 %v4959_v12 }
  0x46   : > { %561 = vmatprep.mubr.f32.mxu1 %v6431_v2  ;;  %645 = vmatprep.mubr.f32.mxu0 %v6431_v2 }
  0x47   : > { %895 = vmatpush1.msra.mxu0 %v469_v37 }
  0x48   : > { %1153 = vmatprep.subr.mxu0 %v5141_v31 }
  0x49   : > { %563 = vmatmul.mubr.f32.gmra.mxu1 %v5099_v5  ;;  %648 = vmatmul.mubr.f32.gmra.mxu0 %v4962_v13 }
  0x4a   : > { %653 = vmatprep.mubr.f32.mxu0 %v6431_v2  ;;  %776 = vmatprep.mubr.f32.mxu1 %v6431_v2 }
  0x4d   : > { %656 = vmatmul.mubr.f32.gmra.mxu0 %v4978_v16  ;;  %780 = vmatmul.mubr.f32.vlgmr.msra.gmra.mxu1 %v4975_v15 }
  0x4e   : > { %661 = vmatprep.mubr.f32.mxu0 %v6431_v2  ;;  %785 = vmatprep.mubr.f32.mxu1 %v6431_v2 }
  0x4f   : > { %1025 = vmatpush1.msra.mxu1 %v4996_v25  ;;  %v261_v25 = vsel %vm256_vm1, %v173_v14, 0 }
  0x50   : > { %1323 = vmatprep.subr.mxu1 %v1322_v42  ;;  %v5193_v34 = vand.u32 4294901760, %v261_v25 }
  0x51   : > { %664 = vmatmul.mubr.f32.gmra.mxu0 %v5005_v29  ;;  %789 = vmatmul.mubr.f32.gmra.mxu1 %v4989_v20 }
  0x52   : > { %669 = vmatprep.mubr.f32.mxu0 %v6431_v2  ;;  %794 = vmatprep.mubr.f32.mxu1 %v6431_v2  ;;  %v5200_v37 = vsub.f32 %v261_v25, %v5193_v34 }
  0x54   : > { %v1326_v44 = vand.u32 4294901760, %v5200_v37 }
  0x55   : > { %672 = vmatmul.mubr.f32.gmra.mxu0 %v5029_v39  ;;  %798 = vmatmul.mubr.f32.gmra.mxu1 %v5002_v28 }
  0x56   : > { %677 = vmatprep.mubr.f32.mxu0 %v6431_v2  ;;  %803 = vmatprep.mubr.f32.mxu1 %v6431_v2  ;;  %v1327_v45 = vsub.f32 %v5200_v37, %v1326_v44 }
  0x58   : > { %v1328_v46 = vand.u32 4294901760, %v1327_v45 }
  0x59   : > { %680 = vmatmul.mubr.f32.gmra.mxu0 %v5048_v50  ;;  %807 = vmatmul.mubr.f32.gmra.mxu1 %v5026_v38 }
  0x5a   : > { %685 = vmatprep.mubr.f32.mxu0 %v6431_v2  ;;  %812 = vmatprep.mubr.f32.mxu1 %v6431_v2 }
  0x5d   : > { %688 = vmatmul.mubr.f32.gmra.mxu0 %v5077_v61  ;;  %816 = vmatmul.mubr.f32.gmra.mxu1 %v5058_v55 }
  0x5e   : > { %693 = vmatprep.mubr.f32.mxu0 %v6431_v2  ;;  %821 = vmatprep.mubr.f32.mxu1 %v6431_v2 }
  0x61   : > { %696 = vmatmul.mubr.f32.gmra.mxu0 %v5097_v4  ;;  %825 = vmatmul.mubr.f32.gmra.mxu1 %v5068_v58 }
  0x62   : > { %701 = vmatprep.mubr.f32.mxu0 %v6431_v2  ;;  %830 = vmatprep.mubr.f32.mxu1 %v6431_v2 }
  0x65   : > { %704 = vmatmul.mubr.f32.gmra.mxu0 %v5115_v19  ;;  %834 = vmatmul.mubr.f32.gmra.mxu1 %v5094_v3 }
  0x66   : > { %839 = vmatprep.mubr.f32.mxu1 %v6431_v2  ;;  %928 = vmatprep.mubr.f32.mxu0 %v6431_v2 }
  0x69   : > { %843 = vmatmul.mubr.f32.gmra.mxu1 %v5112_v11  ;;  %930 = vmatmul.mubr.f32.vlgmr.msra.gmra.mxu0 %v4948_v7 }
  0x6a   : > { %848 = vmatprep.mubr.f32.mxu1 %v6431_v2  ;;  %935 = vmatprep.mubr.f32.mxu0 %v6431_v2 }
  0x6b   : > { %1155 = vmatpush1.msra.mxu0 %v5193_v34 }
  0x6c   : > { %1458 = vmatprep.subr.mxu0 %v5150_v35 }
  0x6d   : > { %852 = vmatmul.mubr.f32.gmra.mxu1 %v5128_v23  ;;  %937 = vmatmul.mubr.f32.gmra.mxu0 %v4950_v8 }
  0x6e   : > { %942 = vmatprep.mubr.f32.mxu0 %v6431_v2  ;;  %1058 = vmatprep.mubr.f32.mxu1 %v6431_v2 }
  0x71   : > { %944 = vmatmul.mubr.f32.gmra.mxu0 %v4954_v10  ;;  %1060 = vmatmul.mubr.f32.vlgmr.msra.gmra.mxu1 %v4948_v7 }
  0x72   : > { %949 = vmatprep.mubr.f32.mxu0 %v6431_v2  ;;  %1065 = vmatprep.mubr.f32.mxu1 %v6431_v2 }
  0x73   : > { %1329 = vmatpush1.msra.mxu1 %v1328_v46 }
  0x74   : > { %1598 = vmatprep.subr.mxu1 %v5141_v31 }
  0x75   : > { %951 = vmatmul.mubr.f32.gmra.mxu0 %v4980_v17  ;;  %1067 = vmatmul.mubr.f32.gmra.mxu1 %v4950_v8 }
  0x76   : > { %956 = vmatprep.mubr.f32.mxu0 %v6431_v2  ;;  %1072 = vmatprep.mubr.f32.mxu1 %v6431_v2 }
  0x79   : > { %958 = vmatmul.mubr.f32.gmra.mxu0 %v5007_v30  ;;  %1074 = vmatmul.mubr.f32.gmra.mxu1 %v4954_v10 }
  0x7a   : > { %963 = vmatprep.mubr.f32.mxu0 %v6431_v2  ;;  %1079 = vmatprep.mubr.f32.mxu1 %v6431_v2 }
  0x7d   : > { %965 = vmatmul.mubr.f32.gmra.mxu0 %v5031_v40  ;;  %1081 = vmatmul.mubr.f32.gmra.mxu1 %v4980_v17 }
  0x7e   : > { %970 = vmatprep.mubr.f32.mxu0 %v6431_v2  ;;  %1086 = vmatprep.mubr.f32.mxu1 %v6431_v2 }
  0x81   : > { %972 = vmatmul.mubr.f32.gmra.mxu0 %v5050_v51  ;;  %1088 = vmatmul.mubr.f32.gmra.mxu1 %v5007_v30 }
  0x82   : > { %977 = vmatprep.mubr.f32.mxu0 %v6431_v2  ;;  %1093 = vmatprep.mubr.f32.mxu1 %v6431_v2 }
  0x85   : > { %979 = vmatmul.mubr.f32.gmra.mxu0 %v5079_v62  ;;  %1095 = vmatmul.mubr.f32.gmra.mxu1 %v5031_v40 }
  0x86   : > { %984 = vmatprep.mubr.f32.mxu0 %v6431_v2  ;;  %1100 = vmatprep.mubr.f32.mxu1 %v6431_v2 }
  0x89   : > { %986 = vmatmul.mubr.f32.gmra.mxu0 %v5099_v5  ;;  %1102 = vmatmul.mubr.f32.gmra.mxu1 %v5050_v51 }
  0x8a   : > { %1107 = vmatprep.mubr.f32.mxu1 %v6431_v2  ;;  %1188 = vmatprep.mubr.f32.mxu0 %v6431_v2 }
  0x8d   : > { %1109 = vmatmul.mubr.f32.gmra.mxu1 %v5079_v62  ;;  %1194 = vmatmul.mubr.f32.vlgmr.msra.gmra.mxu0 %v5011_v32 }
  0x8e   : > { %1114 = vmatprep.mubr.f32.mxu1 %v6431_v2  ;;  %1199 = vmatprep.mubr.f32.mxu0 %v6431_v2 }
  0x8f   : > { %1461 = vmatpush1.msra.mxu0 %v5200_v37 }
  0x90   : > { %1748 = vmatprep.subr.mxu0 %v1320_v36 }
  0x91   : > { %1116 = vmatmul.mubr.f32.gmra.mxu1 %v5099_v5  ;;  %1205 = vmatmul.mubr.f32.gmra.mxu0 %v5035_v43 }
  0x92   : > { %1210 = vmatprep.mubr.f32.mxu0 %v6431_v2  ;;  %1362 = vmatprep.mubr.f32.mxu1 %v6431_v2 }
  0x95   : > { %1216 = vmatmul.mubr.f32.gmra.mxu0 %v5053_v53  ;;  %1364 = vmatmul.mubr.f32.vlgmr.msra.gmra.mxu1 %v4948_v7 }
  0x96   : > { %1221 = vmatprep.mubr.f32.mxu0 %v6431_v2  ;;  %1369 = vmatprep.mubr.f32.mxu1 %v6431_v2 }
  0x97   : > { %1600 = vmatpush1.msra.mxu1 %v5193_v34 }
  0x98   : > { %1880 = vmatprep.subr.mxu1 %v5141_v31 }
  0x99   : > { %1227 = vmatmul.mubr.f32.gmra.mxu0 %v5072_v59  ;;  %1371 = vmatmul.mubr.f32.gmra.mxu1 %v4950_v8 }
  0x9a   : > { %1232 = vmatprep.mubr.f32.mxu0 %v6431_v2  ;;  %1376 = vmatprep.mubr.f32.mxu1 %v6431_v2 }
  0x9d   : > { %1238 = vmatmul.mubr.f32.gmra.mxu0 %v5091_v1  ;;  %1378 = vmatmul.mubr.f32.gmra.mxu1 %v4954_v10 }
  0x9e   : > { %1243 = vmatprep.mubr.f32.mxu0 %v6431_v2  ;;  %1383 = vmatprep.mubr.f32.mxu1 %v6431_v2 }
  0xa1   : > { %1249 = vmatmul.mubr.f32.gmra.mxu0 %v5107_v6  ;;  %1385 = vmatmul.mubr.f32.gmra.mxu1 %v4980_v17 }
  0xa2   : > { %1254 = vmatprep.mubr.f32.mxu0 %v6431_v2  ;;  %1390 = vmatprep.mubr.f32.mxu1 %v6431_v2 }
  0xa5   : > { %1260 = vmatmul.mubr.f32.gmra.mxu0 %v5123_v21  ;;  %1392 = vmatmul.mubr.f32.gmra.mxu1 %v5007_v30 }
  0xa6   : > { %1265 = vmatprep.mubr.f32.mxu0 %v6431_v2  ;;  %1397 = vmatprep.mubr.f32.mxu1 %v6431_v2 }
  0xa9   : > { %1271 = vmatmul.mubr.f32.gmra.mxu0 %v5134_v18  ;;  %1399 = vmatmul.mubr.f32.gmra.mxu1 %v5031_v40 }
  0xaa   : > { %1276 = vmatprep.mubr.f32.mxu0 %v6431_v2  ;;  %1404 = vmatprep.mubr.f32.mxu1 %v6431_v2 }
  0xad   : > { %1282 = vmatmul.mubr.f32.gmra.mxu0 %v5145_v33  ;;  %1406 = vmatmul.mubr.f32.gmra.mxu1 %v5050_v51 }
  0xae   : > { %1411 = vmatprep.mubr.f32.mxu1 %v6431_v2  ;;  %1494 = vmatprep.mubr.f32.mxu0 %v6431_v2 }
  0xb1   : > { %1413 = vmatmul.mubr.f32.gmra.mxu1 %v5079_v62  ;;  %1497 = vmatmul.mubr.f32.vlgmr.msra.gmra.mxu0 %v4959_v12  ;;  %v5339_v12 = vpop.permute.xlu1 %195 }
  0xb2   : > { %1418 = vmatprep.mubr.f32.mxu1 %v6431_v2  ;;  %1502 = vmatprep.mubr.f32.mxu0 %v6431_v2 }
  0xb3   : > { %1752 = vmatpush1.msra.mxu0 %v1326_v44 }
  0xb5   : > { %1420 = vmatmul.mubr.f32.gmra.mxu1 %v5099_v5  ;;  %1505 = vmatmul.mubr.f32.gmra.mxu0 %v4962_v13 }
  0xb6   : > { %1510 = vmatprep.mubr.f32.mxu0 %v6431_v2  ;;  %1633 = vmatprep.mubr.f32.mxu1 %v6431_v2 }
  0xb9   : > { %1513 = vmatmul.mubr.f32.gmra.mxu0 %v4978_v16  ;;  %1637 = vmatmul.mubr.f32.vlgmr.msra.gmra.mxu1 %v4975_v15  ;;  %v5349_v16 = vpop.permute.xlu1 %190 }
  0xba   : > { %1518 = vmatprep.mubr.f32.mxu0 %v6431_v2  ;;  %1642 = vmatprep.mubr.f32.mxu1 %v6431_v2 }
  0xbb   : > { %1882 = vmatpush1.msra.mxu1 %v5193_v34 }
  0xbd   : > { %1521 = vmatmul.mubr.f32.gmra.mxu0 %v5005_v29  ;;  %1646 = vmatmul.mubr.f32.gmra.mxu1 %v4989_v20  ;;  %v5373_v48 = vpop.permute.xlu1 %220 }
  0xbe   : > { %1526 = vmatprep.mubr.f32.mxu0 %v6431_v2  ;;  %1651 = vmatprep.mubr.f32.mxu1 %v6431_v2  ;;  %6452 = vst [vmem:[#allocation5_spill] sm:$0xff] %v5373_v48 }
  0xc1   : > { %1529 = vmatmul.mubr.f32.gmra.mxu0 %v5029_v39  ;;  %1655 = vmatmul.mubr.f32.gmra.mxu1 %v5002_v28  ;;  %v5395_v59 = vpop.permute.xlu1 %210 }
  0xc2   : > { %1534 = vmatprep.mubr.f32.mxu0 %v6431_v2  ;;  %1660 = vmatprep.mubr.f32.mxu1 %v6431_v2  ;;  %6454 = vst [vmem:[#allocation7_spill] sm:$0xff] %v5395_v59 }
  0xc5   : > { %1537 = vmatmul.mubr.f32.gmra.mxu0 %v5048_v50  ;;  %1664 = vmatmul.mubr.f32.gmra.mxu1 %v5026_v38 }
  0xc6   : > { %1542 = vmatprep.mubr.f32.mxu0 %v6431_v2  ;;  %1669 = vmatprep.mubr.f32.mxu1 %v6431_v2 }
  0xc9   : > { %1545 = vmatmul.mubr.f32.gmra.mxu0 %v5077_v61  ;;  %1673 = vmatmul.mubr.f32.gmra.mxu1 %v5058_v55 }
  0xca   : > { %1550 = vmatprep.mubr.f32.mxu0 %v6431_v2  ;;  %1678 = vmatprep.mubr.f32.mxu1 %v6431_v2 }
  0xcd   : > { %1553 = vmatmul.mubr.f32.gmra.mxu0 %v5097_v4  ;;  %1682 = vmatmul.mubr.f32.gmra.mxu1 %v5068_v58 }
  0xce   : > { %1558 = vmatprep.mubr.f32.mxu0 %v6431_v2  ;;  %1687 = vmatprep.mubr.f32.mxu1 %v6431_v2 }
  0xd1   : > { %1561 = vmatmul.mubr.f32.gmra.mxu0 %v5115_v19  ;;  %1691 = vmatmul.mubr.f32.gmra.mxu1 %v5094_v3 }
  0xd2   : > { %1696 = vmatprep.mubr.f32.mxu1 %v6431_v2  ;;  %1785 = vmatprep.mubr.f32.mxu0 %v6431_v2 }
  0xd5   : > { %1700 = vmatmul.mubr.f32.gmra.mxu1 %v5112_v11  ;;  %1787 = vmatmul.mubr.f32.vlgmr.msra.gmra.mxu0 %v4948_v7 }
  0xd6   : > { %1705 = vmatprep.mubr.f32.mxu1 %v6431_v2  ;;  %1792 = vmatprep.mubr.f32.mxu0 %v6431_v2 }
  0xd9   : > { %1709 = vmatmul.mubr.f32.gmra.mxu1 %v5128_v23  ;;  %1794 = vmatmul.mubr.f32.gmra.mxu0 %v4950_v8 }
  0xda   : > { %1799 = vmatprep.mubr.f32.mxu0 %v6431_v2  ;;  %1915 = vmatprep.mubr.f32.mxu1 %v6431_v2 }
  0xdd   : > { %1801 = vmatmul.mubr.f32.gmra.mxu0 %v4954_v10  ;;  %1917 = vmatmul.mubr.f32.vlgmr.msra.gmra.mxu1 %v4948_v7  ;;  %v5351_v7 = vpop.permute.xlu0 %205 }
  0xde   : > { %1806 = vmatprep.mubr.f32.mxu0 %v6431_v2  ;;  %1922 = vmatprep.mubr.f32.mxu1 %v6431_v2 }
  0xe1   : > { %v338_v13 = vpop.f32.mrf.mxu0  ;;  %1808 = vmatmul.mubr.f32.gmra.mxu0 %v4980_v17  ;;  %1924 = vmatmul.mubr.f32.gmra.mxu1 %v4950_v8 }
  0xe2   : > { %1813 = vmatprep.mubr.f32.mxu0 %v6431_v2  ;;  %1929 = vmatprep.mubr.f32.mxu1 %v6431_v2  ;;  %v339_v8 = vadd.f32 %v338_v13, %v5349_v16 }
  0xe3   : > { %v5347_v15 = vpop.f32.mrf.mxu0 }
  0xe5   : > { %v349_v20 = vpop.f32.mrf.mxu0  ;;  %1815 = vmatmul.mubr.f32.gmra.mxu0 %v5007_v30  ;;  %1931 = vmatmul.mubr.f32.gmra.mxu1 %v4954_v10  ;;  %v5367_v10 = vpop.permute.xlu0 %200 }
  0xe6   : > { %1820 = vmatprep.mubr.f32.mxu0 %v6431_v2  ;;  %1936 = vmatprep.mubr.f32.mxu1 %v6431_v2  ;;  %v350_v38 = vadd.f32 %v349_v20, %v5339_v12 }
  0xe7   : > { %v5358_v28 = vpop.f32.mrf.mxu0 }
  0xe9   : > { %v360_v29 = vpop.f32.mrf.mxu0  ;;  %v508_v32 = vpop.f32.mrf.mxu1  ;;  %1822 = vmatmul.mubr.f32.gmra.mxu0 %v5031_v40  ;;  %1938 = vmatmul.mubr.f32.gmra.mxu1 %v4980_v17 }
  0xea   : > { %v5363_v39 = vadd.f32 %v508_v32, %v339_v8  ;;  %1827 = vmatprep.mubr.f32.mxu0 %v6431_v2  ;;  %1943 = vmatprep.mubr.f32.mxu1 %v6431_v2  ;;  %v361_v52 = vadd.f32 %v360_v29, %v5367_v10  ;;  %v5386_v55 = vpop.permute.xlu0 %225 }
  0xeb   : > { %v5369_v43 = vpop.f32.mrf.mxu0  ;;  %v5371_v47 = vpop.f32.mrf.mxu1  ;;  %6453 = vst [vmem:[#allocation6_spill] sm:$0xff] %v5386_v55 }
  0xed   : > { %v371_v49 = vpop.f32.mrf.mxu0  ;;  %v515_v50 = vpop.f32.mrf.mxu1  ;;  %1829 = vmatmul.mubr.f32.gmra.mxu0 %v5050_v51  ;;  %1945 = vmatmul.mubr.f32.gmra.mxu1 %v5007_v30 }
  0xee   : > { %v5377_v17 = vadd.f32 %v515_v50, %v350_v38  ;;  %1834 = vmatprep.mubr.f32.mxu0 %v6431_v2  ;;  %1950 = vmatprep.mubr.f32.mxu1 %v6431_v2  ;;  %v372_v30 = vadd.f32 %v371_v49, %v5351_v7  ;;  %v5407_v3 = vpop.permute.xlu0 %215 }
  0xef   : > { %v5382_v53 = vpop.f32.mrf.mxu0  ;;  %v5384_v54 = vpop.f32.mrf.mxu1  ;;  %6456 = vst [vmem:[#allocation9_spill] sm:$0xff] %v5407_v3 }
  0xf1   : > { %v382_v56 = vpop.f32.mrf.mxu0  ;;  %v522_v57 = vpop.f32.mrf.mxu1  ;;  %1836 = vmatmul.mubr.f32.gmra.mxu0 %v5079_v62  ;;  %1952 = vmatmul.mubr.f32.gmra.mxu1 %v5031_v40 }
  0xf2   : > { %v5391_v58 = vadd.f32 %v522_v57, %v361_v52  ;;  %1841 = vmatprep.mubr.f32.mxu0 %v6431_v2  ;;  %1957 = vmatprep.mubr.f32.mxu1 %v6431_v2  ;;  %v383_v1 = vadd.f32 %v382_v56, %v5395_v59  ;;  %v5429_v36 = vpop.permute.xlu0 %230 }
  0xf3   : > { %v5397_v60 = vpop.f32.mrf.mxu0  ;;  %v5399_v61 = vpop.f32.mrf.mxu1  ;;  %6462 = vst [vmem:[#allocation15_spill] sm:$0xff] %v5429_v36 }
  0xf4   : > { %6455 = vst [vmem:[#allocation8_spill] sm:$0xff] %v5397_v60 }
  0xf5   : > { %v393_v63 = vpop.f32.mrf.mxu0  ;;  %v529_v0 = vpop.f32.mrf.mxu1  ;;  %1843 = vmatmul.mubr.f32.gmra.mxu0 %v5099_v5  ;;  %1959 = vmatmul.mubr.f32.gmra.mxu1 %v5050_v51 }
  0xf6   : > { %v5403_v40 = vadd.f32 %v529_v0, %v372_v30  ;;  %1964 = vmatprep.mubr.f32.mxu1 %v6431_v2  ;;  %2112 = vmatprep.mubr.f32.mxu0 %v6431_v2  ;;  %v394_v51 = vadd.f32 %v393_v63, %v5407_v3 }
  0xf7   : > { %v5410_v4 = vpop.f32.mrf.mxu0  ;;  %v5412_v6 = vpop.f32.mrf.mxu1 }
  0xf8   : > { %6457 = vst [vmem:[#allocation10_spill] sm:$0xff] %v5410_v4 }
  0xf9   : > { %v404_v9 = vpop.f32.mrf.mxu0  ;;  %v536_v11 = vpop.f32.mrf.mxu1  ;;  %1966 = vmatmul.mubr.f32.gmra.mxu1 %v5079_v62 }
  0xfa   : > { %v537_v19 = vadd.f32 %v536_v11, %v383_v1  ;;  %1971 = vmatprep.mubr.f32.mxu1 %v6431_v2  ;;  %v405_v24 = vadd.f32 %v404_v9, %v5373_v48 }
  0xfb   : > { %v5417_v14 = vpop.f32.mrf.mxu0  ;;  %v5419_v21 = vpop.f32.mrf.mxu1 }
  0xfc   : > { %6458 = vst [vmem:[#allocation11_spill] sm:$0xff] %v5417_v14  ;;  %6459 = vst [vmem:[#allocation12_spill] sm:$0xff] %v5419_v21 }
  0xfd   : > { %v415_v22 = vpop.f32.mrf.mxu0  ;;  %v543_v23 = vpop.f32.mrf.mxu1  ;;  %1973 = vmatmul.mubr.f32.gmra.mxu1 %v5099_v5 }
  0xfe   : > { %v544_v18 = vadd.f32 %v543_v23, %v394_v51  ;;  %2261 = vmatprep.mubr.f32.mxu1 %v6431_v2  ;;  %v416_v33 = vadd.f32 %v415_v22, %v5386_v55 }
  0xff   : > { %v5424_v26 = vpop.f32.mrf.mxu0  ;;  %v5426_v62 = vpop.f32.mrf.mxu1 }
 0x100   : > { %6460 = vst [vmem:[#allocation13_spill] sm:$0xff] %v5424_v26  ;;  %6461 = vst [vmem:[#allocation14_spill] sm:$0xff] %v5426_v62 }
 0x101   : > { %v426_v27 = vpop.f32.mrf.mxu0  ;;  %v550_v31 = vpop.f32.mrf.mxu1 }
 0x102   : > { %v551_v35 = vadd.f32 %v550_v31, %v405_v24  ;;  %v427_v37 = vadd.f32 %v426_v27, %v5429_v36 }
 0x103   : > { %v5431_v41 = vpop.f32.mrf.mxu0  ;;  %v5433_v42 = vpop.f32.mrf.mxu1 }
 0x104   : > { %6463 = vst [vmem:[#allocation16_spill] sm:$0xff] %v5431_v41  ;;  %6464 = vst [vmem:[#allocation17_spill] sm:$0xff] %v5433_v42  ;;  %v374_v42 = vadd.f32 %v5382_v53, %v5351_v7 }
 0x105   : > { %v557_v5 = vpop.f32.mrf.mxu1  ;;  %v5435_v25 = vpop.f32.mrf.mxu0 }
 0x106   : > { %v558_v34 = vadd.f32 %v557_v5, %v416_v33 }
 0x107   : > { %v5438_v44 = vpop.f32.mrf.mxu1  ;;  %v5440_v45 = vpop.f32.mrf.mxu0 }
 0x108   : > { %6465 = vst [vmem:[#allocation18_spill] sm:$0xff] %v5438_v44  ;;  %v642_v44 = vadd.f32 %v5435_v25, %v5363_v39 }
 0x109   : > { %v564_v46 = vpop.f32.mrf.mxu1  ;;  %v5442_v13 = vpop.f32.mrf.mxu0 }
 0x10a   : > { %v565_v20 = vadd.f32 %v564_v46, %v427_v37 }
 0x10b   : > { %v5444_v8 = vpop.f32.mrf.mxu1  ;;  %v651_v29 = vpop.f32.mrf.mxu0 }
 0x10c   : > { %6466 = vst [vmem:[#allocation19_spill] sm:$0xff] %v5444_v8 }
 0x10d   : > { %v5446_v32 = vpop.f32.mrf.mxu0  ;;  %v781_v38 = vpop.f32.mrf.mxu1 }
 0x10f   : > { %v5448_v49 = vpop.f32.mrf.mxu0  ;;  %v5450_v50 = vpop.f32.mrf.mxu1 }
 0x111   : > { %v5452_v52 = vpop.f32.mrf.mxu0  ;;  %v5454_v56 = vpop.f32.mrf.mxu1 }
 0x113   : > { %v5456_v57 = vpop.f32.mrf.mxu0  ;;  %v5458_v30 = vpop.f32.mrf.mxu1 }
 0x115   : > { %v673_v63 = vpop.f32.mrf.mxu0  ;;  %v5460_v0 = vpop.f32.mrf.mxu1 }
 0x116   : > { %v674_v1 = vadd.f32 %v673_v63, %v537_v19 }
 0x117   : > { %v5462_v9 = vpop.f32.mrf.mxu0  ;;  %v5464_v11 = vpop.f32.mrf.mxu1 }
 0x118   : > { %6467 = vst [vmem:[#allocation20_spill] sm:$0xff] %v5462_v9 }
 0x119   : > { %v681_v51 = vpop.f32.mrf.mxu0  ;;  %v5466_v22 = vpop.f32.mrf.mxu1 }
 0x11a   : > { %v682_v23 = vadd.f32 %v681_v51, %v544_v18 }
 0x11b   : > { %v5468_v24 = vpop.f32.mrf.mxu0  ;;  %v5470_v27 = vpop.f32.mrf.mxu1 }
 0x11c   : > { %6468 = vst [vmem:[#allocation21_spill] sm:$0xff] %v5468_v24 }
 0x11d   : > { %v689_v31 = vpop.f32.mrf.mxu0  ;;  %v817_v33 = vpop.f32.mrf.mxu1 }
 0x11e   : > { %v690_v5 = vadd.f32 %v689_v31, %v551_v35  ;;  %v5472_v37 = vadd.f32 %v817_v33, %v674_v1  ;;  %v183_v35 = vld [vmem:[%s6429_s2] sm:$0xff] }
 0x11f   : > { %v5474_v46 = vpop.f32.mrf.mxu0  ;;  %v5476_v19 = vpop.f32.mrf.mxu1 }
 0x120   : > { %6469 = vst [vmem:[#allocation22_spill] sm:$0xff] %v5474_v46  ;;  %6470 = vst [vmem:[#allocation23_spill] sm:$0xff] %v5476_v19 }
 0x121   : > { %v697_v63 = vpop.f32.mrf.mxu0  ;;  %v826_v2 = vpop.f32.mrf.mxu1 }
 0x122   : > { %v698_v8 = vadd.f32 %v697_v63, %v558_v34  ;;  %v5478_v41 = vadd.f32 %v826_v2, %v682_v23  ;;  %v2029_v2 = vsel %vm2027_vm2, %v183_v35, 0 }
 0x123   : > { %v5480_v9 = vpop.f32.mrf.mxu0  ;;  %v5482_v18 = vpop.f32.mrf.mxu1  ;;  %v5498_v46 = vand.u32 4294901760, %v2029_v2 }
 0x124   : > { %6471 = vst [vmem:[#allocation24_spill] sm:$0xff] %v5480_v9  ;;  %6472 = vst [vmem:[#allocation25_spill] sm:$0xff] %v5482_v18 }
 0x125   : > { %v705_v51 = vpop.f32.mrf.mxu0  ;;  %v835_v24 = vpop.f32.mrf.mxu1 }
 0x126   : > { %v706_v1 = vadd.f32 %v705_v51, %v565_v20  ;;  %v5487_v31 = vadd.f32 %v835_v24, %v690_v5  ;;  %v341_v20 = vadd.f32 %v5347_v15, %v5349_v16  ;;  %v352_v51 = vadd.f32 %v5358_v28, %v5339_v12 }
 0x127   : > { %v5489_v33 = vpop.f32.mrf.mxu0  ;;  %v5491_v19 = vpop.f32.mrf.mxu1 }
 0x128   : > { %6473 = vst [vmem:[#allocation26_spill] sm:$0xff] %v5489_v33  ;;  %6474 = vst [vmem:[#allocation27_spill] sm:$0xff] %v5491_v19  ;;  %v511_v35 = vadd.f32 %v5371_v47, %v341_v20  ;;  %v518_v15 = vadd.f32 %v5384_v54, %v352_v51  ;;  %v650_v47 = vadd.f32 %v5442_v13, %v5377_v17 }
 0x129   : > { %v844_v34 = vpop.f32.mrf.mxu1  ;;  %v931_v23 = vpop.f32.mrf.mxu0  ;;  %v363_v54 = vadd.f32 %v5369_v43, %v5367_v10  ;;  %v658_v17 = vadd.f32 %v5446_v32, %v5391_v58  ;;  %v666_v32 = vadd.f32 %v5452_v52, %v5403_v40 }
 0x12a   : > { %v5494_v63 = vadd.f32 %v844_v34, %v698_v8  ;;  %v5510_v34 = vsub.f32 %v2029_v2, %v5498_v46  ;;  %v644_v28 = vadd.f32 %v5440_v45, %v511_v35  ;;  %v652_v20 = vadd.f32 %v651_v29, %v518_v15 }
 0x12b   : > { %v5496_v18 = vpop.f32.mrf.mxu1  ;;  %v933_v9 = vpop.f32.mrf.mxu0  ;;  %v525_v53 = vadd.f32 %v5399_v61, %v363_v54  ;;  %v800_v15 = vadd.f32 %v5460_v0, %v658_v17 }
 0x12c   : > { %6475 = vst [vmem:[#allocation28_spill] sm:$0xff] %v5496_v18  ;;  %v184_v18 = vld [vmem:[%s6429_s2 + $0x8] sm:$0xff]  ;;  %v784_v51 = vadd.f32 %v5450_v50, %v644_v28  ;;  %v5528_v45 = vand.u32 4294901760, %v5510_v34  ;;  %v793_v13 = vadd.f32 %v5458_v30, %v652_v20 }
 0x12d   : > { %v853_v24 = vpop.f32.mrf.mxu1  ;;  %v938_v5 = vpop.f32.mrf.mxu0  ;;  %v2032_v2 = vsel %vm2027_vm2, %v184_v18, 0  ;;  %v660_v58 = vadd.f32 %v5448_v49, %v525_v53 }
 0x12e   : > { %v5504_v33 = vadd.f32 %v853_v24, %v706_v1  ;;  %6477 = vst [vmem:[#allocation30_spill] sm:$0xff] %v5528_v45  ;;  %v934_v43 = vadd.f32 %v933_v9, %v784_v51  ;;  %v5536_v35 = vand.u32 4294901760, %v2032_v2 }
 0x12f   : > { %v5507_v19 = vpop.f32.mrf.mxu1  ;;  %v940_v8 = vpop.f32.mrf.mxu0  ;;  %v802_v0 = vadd.f32 %v5464_v11, %v660_v58 }
 0x130   : > { %6476 = vst [vmem:[#allocation29_spill] sm:$0xff] %v5507_v19  ;;  %v782_v19 = vadd.f32 %v781_v38, %v642_v44  ;;  %v791_v44 = vadd.f32 %v5454_v56, %v650_v47  ;;  %v532_v38 = vadd.f32 %v5412_v6, %v374_v42  ;;  %v941_v62 = vadd.f32 %v940_v8, %v793_v13 }
 0x131   : > { %v945_v1 = vpop.f32.mrf.mxu0  ;;  %v1061_v24 = vpop.f32.mrf.mxu1  ;;  %v5549_v40 = vsub.f32 %v2032_v2, %v5536_v35  ;;  %v185_v2 = vld [vmem:[%s6429_s2 + $0x10] sm:$0xff] }
 0x132   : > { %v932_v29 = vadd.f32 %v931_v23, %v782_v19  ;;  %v939_v28 = vadd.f32 %v938_v5, %v791_v44  ;;  %v668_v56 = vadd.f32 %v5456_v57, %v532_v38  ;;  %v946_v42 = vadd.f32 %v945_v1, %v800_v15 }
 0x133   : > { %v947_v39 = vpop.f32.mrf.mxu0  ;;  %v1063_v25 = vpop.f32.mrf.mxu1  ;;  %v2116_v23 = vsub.f32 %v5510_v34, %v5528_v45  ;;  %v809_v5 = vadd.f32 %v5466_v22, %v666_v32  ;;  %6478 = vst [vmem:[#allocation31_spill] sm:$0xff] %v5549_v40  ;;  %v2035_v15 = vsel %vm2027_vm2, %v185_v2, 0 }
 0x134   : > { %v1062_v26 = vadd.f32 %v1061_v24, %v932_v29  ;;  %v1064_v61 = vadd.f32 %v1063_v25, %v934_v43  ;;  %v811_v49 = vadd.f32 %v5470_v27, %v668_v56  ;;  %v948_v47 = vadd.f32 %v947_v39, %v802_v0 }
 0x135   : > { %v952_v18 = vpop.f32.mrf.mxu0  ;;  %v1068_v50 = vpop.f32.mrf.mxu1 }
 0x136   : > { %v1069_v9 = vadd.f32 %v1068_v50, %v939_v28  ;;  %vm1979_vm3 = vcmp.gt.f32.partialorder %v1062_v26, 0.0  ;;  %vm1980_vm4 = vcmp.gt.f32.partialorder %v1064_v61, 0.0  ;;  %v953_v22 = vadd.f32 %v952_v18, %v809_v5 }
 0x137   : > { %v954_v30 = vpop.f32.mrf.mxu0  ;;  %v1070_v6 = vpop.f32.mrf.mxu1  ;;  %v1996_v51 = vmul.f32 0.01, %v1064_v61 }
 0x138   : > { %v1071_v19 = vadd.f32 %v1070_v6, %v941_v62  ;;  %v1995_v62 = vmul.f32 0.01, %v1062_v26  ;;  %v1999_v54 = vmul.f32 0.01, %v1069_v9  ;;  %vm1983_vm7 = vcmp.gt.f32.partialorder %v1069_v9, 0.0 }
 0x139   : > { %v959_v8 = vpop.f32.mrf.mxu0  ;;  %v1075_v24 = vpop.f32.mrf.mxu1  ;;  %v955_v25 = vadd.f32 %v954_v30, %v811_v49  ;;  %v2012_v56 = vsel %vm1980_vm4, %v1064_v61, %v1996_v51 }
 0x13a   : > { %v2000_v52 = vmul.f32 0.01, %v1071_v19  ;;  %v960_v57 = vadd.f32 %v959_v8, %v5472_v37  ;;  %v1076_v1 = vadd.f32 %v1075_v24, %v946_v42  ;;  %vm1984_vm5 = vcmp.gt.f32.partialorder %v1071_v19, 0.0 }
 0x13b   : > { %v5552_v20 = vpop.f32.mrf.mxu0  ;;  %v1077_v11 = vpop.f32.mrf.mxu1  ;;  %v2011_v38 = vsel %vm1979_vm3, %v1062_v26, %v1995_v62  ;;  %v2015_v28 = vsel %vm1983_vm7, %v1069_v9, %v1999_v54  ;;  %v5583_v62 = vand.u32 4294901760, %v2012_v56 }
 0x13c   : > { %6479 = vst [vmem:[#allocation32_spill] sm:$0xff] %v5552_v20  ;;  %vm1987_vm6 = vcmp.gt.f32.partialorder %v1076_v1, 0.0  ;;  %v2003_v27 = vmul.f32 0.01, %v1076_v1  ;;  %v1078_v37 = vadd.f32 %v1077_v11, %v948_v47  ;;  %v2016_v39 = vsel %vm1984_vm5, %v1071_v19, %v2000_v52 }
 0x13d   : > { %v966_v17 = vpop.f32.mrf.mxu0  ;;  %v1082_v44 = vpop.f32.mrf.mxu1  ;;  %v5563_v30 = vand.u32 4294901760, %v2016_v39  ;;  %v5569_v49 = vand.u32 4294901760, %v2015_v28  ;;  %v5590_v54 = vand.u32 4294901760, %v2011_v38 }
 0x13e   : > { %v2019_v13 = vsel %vm1987_vm6, %v1076_v1, %v2003_v27  ;;  %v967_v29 = vadd.f32 %v966_v17, %v5478_v41  ;;  %v1083_v53 = vadd.f32 %v1082_v44, %v953_v22  ;;  %vm1988_vm8 = vcmp.gt.f32.partialorder %v1078_v37, 0.0  ;;  %v186_v1 = vld [vmem:[%s6429_s2 + $0x18] sm:$0xff] }
 0x13f   : > { %v2004_v43 = vmul.f32 0.01, %v1078_v37  ;;  %v5559_v18 = vpop.f32.mrf.mxu0  ;;  %v1084_v50 = vpop.f32.mrf.mxu1  ;;  %v5565_v6 = vand.u32 4294901760, %v2019_v13  ;;  %v5588_v22 = vand.u32 4294901760, %v2035_v15  ;;  %v2038_v44 = vsel %vm2027_vm2, %v186_v1, 0 }
 0x140   : > { %6480 = vst [vmem:[#allocation33_spill] sm:$0xff] %v5559_v18  ;;  %vm1991_vm9 = vcmp.gt.f32.partialorder %v1083_v53, 0.0  ;;  %v2007_v58 = vmul.f32 0.01, %v1083_v53  ;;  %v1085_v32 = vadd.f32 %v1084_v50, %v955_v25  ;;  %v5601_v25 = vsub.f32 %v2016_v39, %v5563_v30 }
 0x141   : > { %v2020_v41 = vsel %vm1988_vm8, %v1078_v37, %v2004_v43  ;;  %v973_v42 = vpop.f32.mrf.mxu0  ;;  %v1089_v26 = vpop.f32.mrf.mxu1 }
 0x142   : > { %v5567_v19 = vand.u32 4294901760, %v2020_v41  ;;  %v2023_v0 = vsel %vm1991_vm9, %v1083_v53, %v2007_v58  ;;  %vm1992_vm10 = vcmp.gt.f32.partialorder %v1085_v32, 0.0  ;;  %v2008_v5 = vmul.f32 0.01, %v1085_v32 }
 0x143   : > { %v5571_v9 = vand.u32 4294901760, %v2023_v0  ;;  %v974_v8 = vadd.f32 %v973_v42, %v5487_v31  ;;  %v5574_v24 = vadd.f32 %v1089_v26, %v960_v57  ;;  %v5576_v61 = vpop.f32.mrf.mxu0  ;;  %v5578_v52 = vpop.f32.mrf.mxu1  ;;  %v5593_v31 = vsub.f32 %v2019_v13, %v5565_v6 }
 0x144   : > { %6482 = vst [vmem:[#allocation35_spill] sm:$0xff] %v5576_v61  ;;  %6483 = vst [vmem:[#allocation36_spill] sm:$0xff] %v5578_v52  ;;  %v5586_v47 = vsub.f32 %v2020_v41, %v5567_v19  ;;  %v2024_v11 = vsel %vm1992_vm10, %v1085_v32, %v2008_v5  ;;  %v5608_v53 = vsub.f32 %v2015_v28, %v5569_v49  ;;  %v5625_v28 = vand.u32 4294901760, %v5549_v40 }
 0x145   : > { %6481 = vst [vmem:[#allocation34_spill] sm:$0xff] %v5574_v24  ;;  %v5596_v57 = vsub.f32 %v2023_v0, %v5571_v9  ;;  %v5598_v27 = vand.u32 4294901760, %v2024_v11  ;;  %v980_v2 = vpop.f32.mrf.mxu0  ;;  %v1096_v51 = vpop.f32.mrf.mxu1  ;;  %v5628_v58 = vsub.f32 %v2035_v15, %v5588_v22  ;;  %v5631_v32 = vsub.f32 %v2011_v38, %v5590_v54 }
 0x146   : > { %v981_v37 = vadd.f32 %v980_v2, %v5494_v63  ;;  %v5604_v17 = vadd.f32 %v1096_v51, %v967_v29  ;;  %v6435_v63 = vand.u32 4294901760, %v5586_v47  ;;  %v5621_v29 = vsub.f32 %v2012_v56, %v5583_v62  ;;  %6487 = vst [vmem:[#allocation40_spill] sm:$0xff] %v5625_v28 }
 0x147   : > { %v5611_v13 = vsub.f32 %v2024_v11, %v5598_v27  ;;  %v5613_v43 = vpop.f32.mrf.mxu0  ;;  %v5615_v50 = vpop.f32.mrf.mxu1  ;;  %2065 = vmatprep.subr.mxu0 %v5598_v27  ;;  %v6433_v39 = vand.u32 4294901760, %v5596_v57  ;;  %6488 = vst [vmem:[#allocation41_spill] sm:$0xff] %v5628_v58  ;;  %v5636_v0 = vand.u32 4294901760, %v2038_v44  ;;  %v6496_v24 = vand.u32 4294901760, %v5601_v25 }
 0x148   : > { %6484 = vst [vmem:[#allocation37_spill] sm:$0xff] %v5604_v17  ;;  %6485 = vst [vmem:[#allocation38_spill] sm:$0xff] %v5613_v43  ;;  %2067 = vmatpush1.msra.mxu0 %v5571_v9  ;;  %v2196_v51 = vsub.f32 %v5586_v47, %v6435_v63  ;;  %v5672_v63 = vand.u32 4294901760, %v5628_v58  ;;  %v6502_v17 = vmov 0.0   ;;  %v6508_v20 = vand.u32 4294901760, %v5593_v31 }
 0x149   : > { %6486 = vst [vmem:[#allocation39_spill] sm:$0xff] %v5615_v50  ;;  %v987_v41 = vpop.f32.mrf.mxu0  ;;  %v1103_v42 = vpop.f32.mrf.mxu1  ;;  %2069 = vmatprep.subr.mxu0 %v5567_v19  ;;  %v6434_v26 = vand.u32 4294901760, %v5611_v13  ;;  %v2190_v38 = vsub.f32 %v5596_v57, %v6433_v39  ;;  %v6503_v50 = vand.u32 4294901760, %v5631_v32 }
 0x14a   : > { %v988_v5 = vadd.f32 %v987_v41, %v5504_v33  ;;  %v5639_v1 = vadd.f32 %v1103_v42, %v974_v8  ;;  %2071 = vmatpush1.msra.mxu0 %v5565_v6  ;;  %v5654_v33 = vand.u32 4294901760, %v2116_v23  ;;  %v2127_v42 = vsub.f32 %v5549_v40, %v5625_v28  ;;  %6493 = vst [vmem:[#allocation45_spill] sm:$0xff] %v5672_v63 }
 0x14b   : > { %v5646_v11 = vpop.f32.mrf.mxu0  ;;  %v5648_v2 = vpop.f32.mrf.mxu1  ;;  %2073 = vmatprep.subr.mxu0 %v5563_v30  ;;  %v2184_v8 = vsub.f32 %v5611_v13, %v6434_v26  ;;  %v6492_v26 = vand.u32 4294901760, %v5593_v31  ;;  %v5675_v41 = vsub.f32 %v2038_v44, %v5636_v0  ;;  %v2191_v39 = vand.u32 4294901760, %v2190_v38 }
 0x14c   : > { %6489 = vst [vmem:[#allocation42_spill] sm:$0xff] %v5639_v1  ;;  %6490 = vst [vmem:[#allocation43_spill] sm:$0xff] %v5646_v11  ;;  %2075 = vmatpush1.msra.mxu0 %v5569_v49  ;;  %v2197_v44 = vand.u32 4294901760, %v2196_v51  ;;  %v5693_v38 = vand.u32 4294901760, %v2127_v42  ;;  %v2138_v51 = vsub.f32 %v5628_v58, %v5672_v63 }
 0x14d   : > { %6491 = vst [vmem:[#allocation44_spill] sm:$0xff] %v5648_v2  ;;  %v1110_v15 = vpop.f32.mrf.mxu1  ;;  %v1195_v23 = vpop.f32.mrf.mxu0  ;;  %2077 = vmatprep.subr.mxu0 %v5583_v62  ;;  %v2185_v56 = vand.u32 4294901760, %v2184_v8  ;;  %v2202_v11 = vsub.f32 %v5593_v31, %v6492_v26  ;;  %6494 = vst [vmem:[#allocation46_spill] sm:$0xff] %v5675_v41  ;;  %v2208_v2 = vsub.f32 %v5601_v25, %v6496_v24  ;;  %v6499_v24 = vand.u32 4294901760, %v5621_v29 }
 0x14e   : > { %v5677_v1 = vadd.f32 %v1110_v15, %v981_v37  ;;  %2079 = vmatpush1.msra.mxu0 %v5590_v54  ;;  %v6498_v37 = vand.u32 4294901760, %v5608_v53 }
 0x14f   : > { %v5684_v43 = vpop.f32.mrf.mxu1  ;;  %v5686_v26 = vpop.f32.mrf.mxu0  ;;  %2118 = vmatmul.mubr.f32.vlgmr.msra.gmra.mxu0 %v5654_v33  ;;  %2186 = vmatprep.subr.mxu1 %v2185_v56  ;;  %v2220_v8 = vsub.f32 %v5621_v29, %v6499_v24  ;;  %v2203_v56 = vand.u32 4294901760, %v2202_v11  ;;  %v2209_v24 = vand.u32 4294901760, %v2208_v2 }
 0x150   : > { %6495 = vst [vmem:[#allocation47_spill] sm:$0xff] %v5677_v1  ;;  %6497 = vst [vmem:[#allocation48_spill] sm:$0xff] %v5684_v43  ;;  %v2214_v15 = vsub.f32 %v5608_v53, %v6498_v37  ;;  %2316 = vmatprep.subr.mxu0 %v5611_v13  ;;  %2192 = vmatpush1.msra.mxu1 %v2191_v39  ;;  %v5702_v37 = vand.u32 4294901760, %v5675_v41  ;;  %v1196_v39 = vadd.f32 %v1195_v23, %v5349_v16 }
 0x151   : > { %2319 = vmatpush1.msra.mxu0 %v5596_v57  ;;  %v1117_v1 = vpop.f32.mrf.mxu1  ;;  %v1206_v43 = vpop.f32.mrf.mxu0  ;;  %2198 = vmatprep.subr.mxu1 %v2197_v44  ;;  %v2226_v44 = vsub.f32 %v5631_v32, %v6503_v50  ;;  %v5717_v23 = vand.u32 4294901760, %v2138_v51 }
 0x152   : > { %6500 = vst [vmem:[#allocation49_spill] sm:$0xff] %v5702_v37  ;;  %v5705_v42 = vadd.f32 %v1117_v1, %v988_v5  ;;  %2322 = vmatprep.subr.mxu0 %v5586_v47  ;;  %2123 = vmatprep.mubr.f32.mxu0 %v6502_v17  ;;  %v2215_v61 = vand.u32 4294901760, %v2214_v15  ;;  %v2221_v5 = vand.u32 4294901760, %v2220_v8  ;;  %v2149_v50 = vsub.f32 %v5675_v41, %v5702_v37 }
 0x153   : > { %2204 = vmatpush1.msra.mxu1 %v2203_v56  ;;  %2325 = vmatpush1.msra.mxu0 %v5593_v31  ;;  %v5713_v11 = vpop.f32.mrf.mxu1  ;;  %v1208_v52 = vpop.f32.mrf.mxu0  ;;  %v1207_v56 = vadd.f32 %v1206_v43, %v5339_v12  ;;  %v2227_v15 = vand.u32 4294901760, %v2226_v44  ;;  %v6510_v31 = vand.u32 4294901760, %v5608_v53 }
 0x154   : > { %6501 = vst [vmem:[#allocation50_spill] sm:$0xff] %v5705_v42  ;;  %6504 = vst [vmem:[#allocation51_spill] sm:$0xff] %v5713_v11  ;;  %2129 = vmatmul.mubr.f32.gmra.mxu0 %v5693_v38  ;;  %2210 = vmatprep.subr.mxu1 %v2209_v24  ;;  %v1209_v24 = vadd.f32 %v1208_v52, %v5339_v12 }
 0x155   : > { %2328 = vmatprep.subr.mxu0 %v5601_v25  ;;  %2216 = vmatpush1.msra.mxu1 %v2215_v61  ;;  %v1217_v1 = vpop.f32.mrf.mxu0  ;;  %v1365_v2 = vpop.f32.mrf.mxu1 }
 0x156   : > { %2331 = vmatpush1.msra.mxu0 %v5608_v53  ;;  %v5723_v42 = vadd.f32 %v1365_v2, %v1196_v39  ;;  %2222 = vmatprep.subr.mxu1 %v2221_v5  ;;  %v5732_v39 = vand.u32 4294901760, %v2149_v50  ;;  %v1218_v44 = vadd.f32 %v1217_v1, %v5367_v10  ;;  %v6505_v5 = vand.u32 4294901760, %v5611_v13 }
 0x157   : > { %2334 = vmatprep.subr.mxu0 %v5621_v29  ;;  %2134 = vmatprep.mubr.f32.mxu0 %v6502_v17  ;;  %v1219_v61 = vpop.f32.mrf.mxu0  ;;  %v5727_v8 = vpop.f32.mrf.mxu1 }
 0x158   : > { %2228 = vmatpush1.msra.mxu1 %v2227_v15  ;;  %2337 = vmatpush1.msra.mxu0 %v5631_v32  ;;  %v1220_v1 = vadd.f32 %v1219_v61, %v5367_v10 }
 0x159   : > { %2140 = vmatmul.mubr.f32.gmra.mxu0 %v5717_v23  ;;  %2263 = vmatmul.mubr.f32.vlgmr.msra.gmra.mxu1 %v5498_v46  ;;  %v1228_v43 = vpop.f32.mrf.mxu0  ;;  %v1372_v51 = vpop.f32.mrf.mxu1 }
 0x15a   : > { %2428 = vmatprep.subr.mxu1 %v5598_v27  ;;  %2539 = vmatprep.subr.mxu0 %v6505_v5  ;;  %v5739_v2 = vadd.f32 %v1372_v51, %v1207_v56  ;;  %v1229_v50 = vadd.f32 %v1228_v43, %v5351_v7  ;;  %v6506_v5 = vand.u32 4294901760, %v5596_v57 }
 0x15b   : > { %2430 = vmatpush1.msra.mxu1 %v5571_v9  ;;  %2145 = vmatprep.mubr.f32.mxu0 %v6502_v17  ;;  %v1230_v15 = vpop.f32.mrf.mxu0  ;;  %v1374_v11 = vpop.f32.mrf.mxu1 }
 0x15c   : > { %2432 = vmatprep.subr.mxu1 %v5567_v19  ;;  %2268 = vmatprep.mubr.f32.mxu1 %v6502_v17  ;;  %v5745_v12 = vadd.f32 %v1374_v11, %v1209_v24  ;;  %v1231_v43 = vadd.f32 %v1230_v15, %v5351_v7  ;;  %v6509_v15 = vand.u32 4294901760, %v5601_v25 }
 0x15d   : > { %2434 = vmatpush1.msra.mxu1 %v5565_v6  ;;  %2151 = vmatmul.mubr.f32.gmra.mxu0 %v5732_v39  ;;  %v1239_v52 = vpop.f32.mrf.mxu0  ;;  %v1379_v13 = vpop.f32.mrf.mxu1 }
 0x15e   : > { %2270 = vmatmul.mubr.f32.gmra.mxu1 %v5536_v35  ;;  %2436 = vmatprep.subr.mxu1 %v5563_v30  ;;  %v5753_v56 = vadd.f32 %v1379_v13, %v1218_v44  ;;  %v1240_v44 = vadd.f32 %v1239_v52, %v5395_v59 }
 0x15f   : > { %2438 = vmatpush1.msra.mxu1 %v5569_v49  ;;  %2275 = vmatprep.mubr.f32.mxu1 %v6502_v17  ;;  %v1241_v11 = vpop.f32.mrf.mxu0  ;;  %v1381_v51 = vpop.f32.mrf.mxu1 }
 0x160   : > { %2440 = vmatprep.subr.mxu1 %v5583_v62  ;;  %2370 = vmatprep.mubr.f32.mxu0 %v6502_v17  ;;  %v5759_v24 = vadd.f32 %v1381_v51, %v1220_v1  ;;  %v6507_v1 = vand.u32 4294901760, %v5586_v47 }
 0x161   : > { %2442 = vmatpush1.msra.mxu1 %v5590_v54  ;;  %2373 = vmatmul.mubr.f32.vlgmr.msra.gmra.mxu0 %v5510_v34  ;;  %v1250_v10 = vpop.f32.mrf.mxu0  ;;  %v1386_v61 = vpop.f32.mrf.mxu1 }
 0x162   : > { %2277 = vmatmul.mubr.f32.gmra.mxu1 %v5588_v22  ;;  %2543 = vmatpush1.msra.mxu0 %v6506_v5  ;;  %v5768_v13 = vadd.f32 %v1386_v61, %v1229_v50  ;;  %v1251_v47 = vadd.f32 %v1250_v10, %v5407_v3  ;;  %v6512_v61 = vand.u32 4294901760, %v5631_v32 }
 0x163   : > { %2654 = vmatprep.subr.mxu1 %v5598_v27  ;;  %2547 = vmatprep.subr.mxu0 %v6507_v1  ;;  %v1252_v51 = vpop.f32.mrf.mxu0  ;;  %v1388_v18 = vpop.f32.mrf.mxu1  ;;  %v1242_v27 = vadd.f32 %v1241_v11, %v5395_v59 }
 0x164   : > { %2551 = vmatpush1.msra.mxu0 %v6508_v20  ;;  %2282 = vmatprep.mubr.f32.mxu1 %v6502_v17  ;;  %v5776_v7 = vadd.f32 %v1388_v18, %v1231_v43  ;;  %v6511_v18 = vand.u32 4294901760, %v5621_v29  ;;  %v1253_v53 = vadd.f32 %v1252_v51, %v5407_v3 }
 0x165   : > { %2555 = vmatprep.subr.mxu0 %v6509_v15  ;;  %v1261_v57 = vpop.f32.mrf.mxu0  ;;  %v1393_v52 = vpop.f32.mrf.mxu1  ;;  %2378 = vmatprep.mubr.f32.mxu0 %v6502_v17 }
 0x166   : > { %2284 = vmatmul.mubr.f32.gmra.mxu1 %v5636_v0  ;;  %2559 = vmatpush1.msra.mxu0 %v6510_v31  ;;  %v5786_v20 = vadd.f32 %v1393_v52, %v1240_v44  ;;  %v1262_v44 = vadd.f32 %v1261_v57, %v5373_v48 }
 0x167   : > { %2563 = vmatprep.subr.mxu0 %v6511_v18  ;;  %2475 = vmatprep.mubr.f32.mxu1 %v6502_v17  ;;  %v1263_v25 = vpop.f32.mrf.mxu0  ;;  %v1395_v50 = vpop.f32.mrf.mxu1 }
 0x168   : > { %2567 = vmatpush1.msra.mxu0 %v6512_v61  ;;  %v5793_v11 = vadd.f32 %v1395_v50, %v1242_v27  ;;  %v1264_v57 = vadd.f32 %v1263_v25, %v5373_v48 }
 0x169   : > { %v1272_v10 = vpop.f32.mrf.mxu0  ;;  %v1400_v43 = vpop.f32.mrf.mxu1  ;;  %2381 = vmatmul.mubr.f32.gmra.mxu0 %v5549_v40 }
 0x16a   : > { %2479 = vmatmul.mubr.f32.vlgmr.msra.gmra.mxu1 %v5528_v45  ;;  %v5799_v29 = vadd.f32 %v1400_v43, %v1251_v47  ;;  %2386 = vmatprep.mubr.f32.mxu0 %v6502_v17  ;;  %v1273_v52 = vadd.f32 %v1272_v10, %v5386_v55 }
 0x16b   : > { %2656 = vmatpush1.msra.mxu1 %v5571_v9  ;;  %2484 = vmatprep.mubr.f32.mxu1 %v6502_v17  ;;  %v1274_v32 = vpop.f32.mrf.mxu0  ;;  %v1402_v5 = vpop.f32.mrf.mxu1 }
 0x16c   : > { %2658 = vmatprep.subr.mxu1 %v5567_v19  ;;  %v5805_v1 = vadd.f32 %v1402_v5, %v1253_v53  ;;  %v1275_v31 = vadd.f32 %v1274_v32, %v5386_v55 }
 0x16d   : > { %2660 = vmatpush1.msra.mxu1 %v5565_v6  ;;  %v1283_v51 = vpop.f32.mrf.mxu0  ;;  %v1407_v15 = vpop.f32.mrf.mxu1  ;;  %2389 = vmatmul.mubr.f32.gmra.mxu0 %v5628_v58 }
 0x16e   : > { %2662 = vmatprep.subr.mxu1 %v5563_v30  ;;  %2488 = vmatmul.mubr.f32.gmra.mxu1 %v5625_v28  ;;  %v5813_v9 = vadd.f32 %v1407_v15, %v1262_v44  ;;  %v1284_v25 = vadd.f32 %v1283_v51, %v5429_v36 }
 0x16f   : > { %2664 = vmatpush1.msra.mxu1 %v5569_v49  ;;  %2493 = vmatprep.mubr.f32.mxu1 %v6502_v17  ;;  %v1285_v19 = vpop.f32.mrf.mxu0  ;;  %v1409_v6 = vpop.f32.mrf.mxu1 }
 0x170   : > { %2666 = vmatprep.subr.mxu1 %v5583_v62  ;;  %v5818_v27 = vadd.f32 %v1409_v6, %v1264_v57  ;;  %2394 = vmatprep.mubr.f32.mxu0 %v6502_v17  ;;  %v1286_v10 = vadd.f32 %v1285_v19, %v5429_v36 }
 0x171   : > { %2668 = vmatpush1.msra.mxu1 %v5590_v54  ;;  %v1414_v47 = vpop.f32.mrf.mxu1  ;;  %v5822_v30 = vpop.f32.mrf.mxu0  ;;  %2397 = vmatmul.mubr.f32.gmra.mxu0 %v5675_v41 }
 0x172   : > { %2497 = vmatmul.mubr.f32.gmra.mxu1 %v5672_v63  ;;  %v1415_v49 = vadd.f32 %v1414_v47, %v1273_v52  ;;  %2600 = vmatprep.mubr.f32.mxu0 %v6502_v17 }
 0x173   : > { %2502 = vmatprep.mubr.f32.mxu1 %v6502_v17  ;;  %v1416_v62 = vpop.f32.mrf.mxu1  ;;  %v5829_v18 = vpop.f32.mrf.mxu0 }
 0x174   : > { %v1417_v54 = vadd.f32 %v1416_v62, %v1275_v31 }
 0x175   : > { %v1421_v50 = vpop.f32.mrf.mxu1  ;;  %v5832_v61 = vpop.f32.mrf.mxu0  ;;  %2602 = vmatmul.mubr.f32.vlgmr.msra.gmra.mxu0 %v5498_v46 }
 0x176   : > { %2506 = vmatmul.mubr.f32.gmra.mxu1 %v5702_v37  ;;  %v1422_v43 = vadd.f32 %v1421_v50, %v1284_v25  ;;  %2607 = vmatprep.mubr.f32.mxu0 %v6502_v17 }
 0x177   : > { %2701 = vmatprep.mubr.f32.mxu1 %v6502_v17  ;;  %v1423_v53 = vpop.f32.mrf.mxu1  ;;  %v5839_v44 = vpop.f32.mrf.mxu0 }
 0x178   : > { %v1424_v32 = vadd.f32 %v1423_v53, %v1286_v10 }
 0x179   : > { %v5841_v5 = vpop.f32.mrf.mxu0  ;;  %v5843_v51 = vpop.f32.mrf.mxu1  ;;  %2609 = vmatmul.mubr.f32.gmra.mxu0 %v5536_v35 }
 0x17a   : > { %2703 = vmatmul.mubr.f32.vlgmr.msra.gmra.mxu1 %v5498_v46  ;;  %2614 = vmatprep.mubr.f32.mxu0 %v6502_v17 }
 0x17b   : > { %2708 = vmatprep.mubr.f32.mxu1 %v6502_v17  ;;  %v5849_v15 = vpop.f32.mrf.mxu0  ;;  %v5851_v57 = vpop.f32.mrf.mxu1 }
 0x17d   : > { %v5853_v52 = vpop.f32.mrf.mxu0  ;;  %v5855_v19 = vpop.f32.mrf.mxu1  ;;  %2616 = vmatmul.mubr.f32.gmra.mxu0 %v5588_v22 }
 0x17e   : > { %2710 = vmatmul.mubr.f32.gmra.mxu1 %v5536_v35  ;;  %2621 = vmatprep.mubr.f32.mxu0 %v6502_v17 }
 0x17f   : > { %2715 = vmatprep.mubr.f32.mxu1 %v6502_v17  ;;  %v5861_v6 = vpop.f32.mrf.mxu0  ;;  %v5863_v47 = vpop.f32.mrf.mxu1 }
 0x181   : > { %v1530_v31 = vpop.f32.mrf.mxu0  ;;  %v5865_v62 = vpop.f32.mrf.mxu1  ;;  %2623 = vmatmul.mubr.f32.gmra.mxu0 %v5636_v0 }
 0x182   : > { %2717 = vmatmul.mubr.f32.gmra.mxu1 %v5588_v22  ;;  %v1531_v25 = vadd.f32 %v1530_v31, %v5786_v20  ;;  %2802 = vmatprep.mubr.f32.mxu0 %v6502_v17 }
 0x183   : > { %2722 = vmatprep.mubr.f32.mxu1 %v6502_v17  ;;  %v1532_v50 = vpop.f32.mrf.mxu0  ;;  %v5872_v10 = vpop.f32.mrf.mxu1 }
 0x184   : > { %v1533_v53 = vadd.f32 %v1532_v50, %v5793_v11 }
 0x185   : > { %v1538_v36 = vpop.f32.mrf.mxu0  ;;  %v5875_v55 = vpop.f32.mrf.mxu1 }
 0x186   : > { %2724 = vmatmul.mubr.f32.gmra.mxu1 %v5636_v0  ;;  %v1539_v21 = vadd.f32 %v1538_v36, %v5799_v29 }
 0x187   : > { %v1540_v14 = vpop.f32.mrf.mxu0  ;;  %v5879_v48 = vpop.f32.mrf.mxu1  ;;  %2951 = vmatprep.mubr.f32.mxu1 %v6502_v17 }
 0x188   : > { %v1541_v20 = vadd.f32 %v1540_v14, %v5805_v1 }
 0x189   : > { %v1546_v31 = vpop.f32.mrf.mxu0  ;;  %v1674_v4 = vpop.f32.mrf.mxu1 }
 0x18a   : > { %v1547_v3 = vadd.f32 %v1546_v31, %v5813_v9  ;;  %v5884_v60 = vadd.f32 %v1674_v4, %v1531_v25 }
 0x18b   : > { %v1548_v11 = vpop.f32.mrf.mxu0  ;;  %v1676_v50 = vpop.f32.mrf.mxu1 }
 0x18c   : > { %v1549_v59 = vadd.f32 %v1548_v11, %v5818_v27  ;;  %v5887_v37 = vadd.f32 %v1676_v50, %v1533_v53 }
 0x18d   : > { %v1554_v36 = vpop.f32.mrf.mxu0  ;;  %v1683_v29 = vpop.f32.mrf.mxu1 }
 0x18e   : > { %v1555_v63 = vadd.f32 %v1554_v36, %v1415_v49  ;;  %v5889_v28 = vadd.f32 %v1683_v29, %v1539_v21  ;;  %v1198_v21 = vadd.f32 %v5686_v26, %v5349_v16  ;;  %v1507_v16 = vadd.f32 %v5832_v61, %v5739_v2 }
 0x18f   : > { %v1556_v41 = vpop.f32.mrf.mxu0  ;;  %v1685_v45 = vpop.f32.mrf.mxu1 }
 0x190   : > { %v1557_v14 = vadd.f32 %v1556_v41, %v1417_v54  ;;  %v5891_v1 = vadd.f32 %v1685_v45, %v1541_v20 }
 0x191   : > { %v1562_v58 = vpop.f32.mrf.mxu0  ;;  %v1692_v9 = vpop.f32.mrf.mxu1 }
 0x192   : > { %v1563_v4 = vadd.f32 %v1562_v58, %v1422_v43  ;;  %v5893_v25 = vadd.f32 %v1692_v9, %v1547_v3  ;;  %v1368_v58 = vadd.f32 %v5727_v8, %v1198_v21  ;;  %v1509_v9 = vadd.f32 %v5839_v44, %v5745_v12 }
 0x193   : > { %v1564_v31 = vpop.f32.mrf.mxu0  ;;  %v1694_v40 = vpop.f32.mrf.mxu1 }
 0x194   : > { %v1565_v27 = vadd.f32 %v1564_v31, %v1424_v32  ;;  %v5895_v53 = vadd.f32 %v1694_v40, %v1549_v59  ;;  %v1499_v59 = vadd.f32 %v5822_v30, %v5723_v42  ;;  %v1501_v40 = vadd.f32 %v5829_v18, %v1368_v58 }
 0x195   : > { %v1701_v11 = vpop.f32.mrf.mxu1  ;;  %v1788_v50 = vpop.f32.mrf.mxu0  ;;  %v1648_v42 = vadd.f32 %v5855_v19, %v1507_v16  ;;  %v1650_v2 = vadd.f32 %v5863_v47, %v1509_v9  ;;  %v1523_v19 = vadd.f32 %v5853_v52, %v5768_v13 }
 0x196   : > { %v5897_v49 = vadd.f32 %v1701_v11, %v1555_v63  ;;  %v1639_v26 = vadd.f32 %v5843_v51, %v1499_v59  ;;  %v1641_v8 = vadd.f32 %v5851_v57, %v1501_v40 }
 0x197   : > { %v1703_v41 = vpop.f32.mrf.mxu1  ;;  %v1790_v45 = vpop.f32.mrf.mxu0 }
 0x198   : > { %v5901_v54 = vadd.f32 %v1703_v41, %v1557_v14  ;;  %v1789_v30 = vadd.f32 %v1788_v50, %v1639_v26  ;;  %v1791_v18 = vadd.f32 %v1790_v45, %v1641_v8  ;;  %v1517_v41 = vadd.f32 %v5849_v15, %v5759_v24 }
 0x199   : > { %v1710_v3 = vpop.f32.mrf.mxu1  ;;  %v1795_v43 = vpop.f32.mrf.mxu0  ;;  %v1525_v50 = vadd.f32 %v5861_v6, %v5776_v7 }
 0x19a   : > { %v5904_v20 = vadd.f32 %v1710_v3, %v1563_v4  ;;  %v1796_v61 = vadd.f32 %v1795_v43, %v1648_v42  ;;  %v1659_v45 = vadd.f32 %v5872_v10, %v1517_v41  ;;  %v1666_v43 = vadd.f32 %v5875_v55, %v1523_v19 }
 0x19b   : > { %v1712_v63 = vpop.f32.mrf.mxu1  ;;  %v1797_v32 = vpop.f32.mrf.mxu0  ;;  %v1668_v24 = vadd.f32 %v5879_v48, %v1525_v50 }
 0x19c   : > { %v5909_v36 = vadd.f32 %v1712_v63, %v1565_v27  ;;  %v1515_v27 = vadd.f32 %v5841_v5, %v5753_v56  ;;  %v1798_v44 = vadd.f32 %v1797_v32, %v1650_v2 }
 0x19d   : > { %v1802_v29 = vpop.f32.mrf.mxu0  ;;  %v1918_v14 = vpop.f32.mrf.mxu1 }
 0x19e   : > { %6513 = vst [vmem:[#allocation52_spill] sm:$0xff] %v5909_v36  ;;  %v1919_v51 = vadd.f32 %v1918_v14, %v1789_v30  ;;  %v1657_v12 = vadd.f32 %v5865_v62, %v1515_v27 }
 0x19f   : > { %v1804_v4 = vpop.f32.mrf.mxu0  ;;  %v1920_v31 = vpop.f32.mrf.mxu1 }
 0x1a0   : > { %v1921_v11 = vadd.f32 %v1920_v31, %v1791_v18  ;;  %v1803_v58 = vadd.f32 %v1802_v29, %v1657_v12  ;;  %vm1981_vm11 = vcmp.gt.f32.partialorder %v1919_v51, 0.0  ;;  %v1997_v6 = vmul.f32 0.01, %v1919_v51 }
 0x1a1   : > { %v1809_v57 = vpop.f32.mrf.mxu0  ;;  %v1925_v21 = vpop.f32.mrf.mxu1  ;;  %v1805_v40 = vadd.f32 %v1804_v4, %v1659_v45 }
 0x1a2   : > { %v1926_v56 = vadd.f32 %v1925_v21, %v1796_v61  ;;  %v1998_v15 = vmul.f32 0.01, %v1921_v11  ;;  %vm1982_vm12 = vcmp.gt.f32.partialorder %v1921_v11, 0.0  ;;  %v1810_v16 = vadd.f32 %v1809_v57, %v1666_v43 }
 0x1a3   : > { %v1811_v5 = vpop.f32.mrf.mxu0  ;;  %v1927_v47 = vpop.f32.mrf.mxu1  ;;  %v2013_v4 = vsel %vm1981_vm11, %v1919_v51, %v1997_v6 }
 0x1a4   : > { %v1928_v3 = vadd.f32 %v1927_v47, %v1798_v44  ;;  %v2001_v63 = vmul.f32 0.01, %v1926_v56  ;;  %vm1985_vm14 = vcmp.gt.f32.partialorder %v1926_v56, 0.0  ;;  %v2014_v48 = vsel %vm1982_vm12, %v1921_v11, %v1998_v15 }
 0x1a5   : > { %v1816_v62 = vpop.f32.mrf.mxu0  ;;  %v1932_v59 = vpop.f32.mrf.mxu1  ;;  %v1812_v26 = vadd.f32 %v1811_v5, %v1668_v24  ;;  %v5936_v21 = vand.u32 4294901760, %v2014_v48 }
 0x1a6   : > { %v2002_v13 = vmul.f32 0.01, %v1928_v3  ;;  %v1817_v52 = vadd.f32 %v1816_v62, %v5884_v60  ;;  %v1933_v7 = vadd.f32 %v1932_v59, %v1803_v58  ;;  %vm1986_vm13 = vcmp.gt.f32.partialorder %v1928_v3, 0.0 }
 0x1a7   : > { %v1818_v10 = vpop.f32.mrf.mxu0  ;;  %v1934_v32 = vpop.f32.mrf.mxu1  ;;  %v2017_v31 = vsel %vm1985_vm14, %v1926_v56, %v2001_v63  ;;  %v5957_v59 = vand.u32 4294901760, %v2013_v4 }
 0x1a8   : > { %vm1989_vm15 = vcmp.gt.f32.partialorder %v1933_v7, 0.0  ;;  %v2005_v55 = vmul.f32 0.01, %v1933_v7  ;;  %v1819_v8 = vadd.f32 %v1818_v10, %v5887_v37  ;;  %v1935_v29 = vadd.f32 %v1934_v32, %v1805_v40 }
 0x1a9   : > { %v1823_v14 = vpop.f32.mrf.mxu0  ;;  %v1939_v9 = vpop.f32.mrf.mxu1  ;;  %v2018_v42 = vsel %vm1986_vm13, %v1928_v3, %v2002_v13  ;;  %v5944_v5 = vand.u32 4294901760, %v2017_v31 }
 0x1aa   : > { %v2021_v60 = vsel %vm1989_vm15, %v1933_v7, %v2005_v55  ;;  %v1824_v30 = vadd.f32 %v1823_v14, %v5889_v28  ;;  %v1940_v18 = vadd.f32 %v1939_v9, %v1810_v16  ;;  %vm1990_vm0 = vcmp.gt.f32.partialorder %v1935_v29, 0.0 }
 0x1ab   : > { %v2006_v27 = vmul.f32 0.01, %v1935_v29  ;;  %v1825_v2 = vpop.f32.mrf.mxu0  ;;  %v1941_v61 = vpop.f32.mrf.mxu1  ;;  %v5938_v41 = vand.u32 4294901760, %v2018_v42  ;;  %v5940_v12 = vand.u32 4294901760, %v2021_v60  ;;  %v5974_v10 = vsub.f32 %v2017_v31, %v5944_v5 }
 0x1ac   : > { %vm1993_vm3 = vcmp.gt.f32.partialorder %v1940_v18, 0.0  ;;  %v2009_v11 = vmul.f32 0.01, %v1940_v18  ;;  %v1826_v57 = vadd.f32 %v1825_v2, %v5891_v1  ;;  %v1942_v37 = vadd.f32 %v1941_v61, %v1812_v26 }
 0x1ad   : > { %v2022_v28 = vsel %vm1990_vm0, %v1935_v29, %v2006_v27  ;;  %v1830_v44 = vpop.f32.mrf.mxu0  ;;  %v1946_v19 = vpop.f32.mrf.mxu1  ;;  %v5960_v13 = vsub.f32 %v2021_v60, %v5940_v12  ;;  %v5968_v40 = vsub.f32 %v2018_v42, %v5938_v41  ;;  %v5983_v29 = vsub.f32 %v2014_v48, %v5936_v21 }
 0x1ae   : > { %v5942_v51 = vand.u32 4294901760, %v2022_v28  ;;  %v2025_v50 = vsel %vm1993_vm3, %v1940_v18, %v2009_v11  ;;  %vm1994_vm4 = vcmp.gt.f32.partialorder %v1942_v37, 0.0  ;;  %v2010_v56 = vmul.f32 0.01, %v1942_v37 }
 0x1af   : > { %v5946_v47 = vand.u32 4294901760, %v2025_v50  ;;  %v1831_v1 = vadd.f32 %v1830_v44, %v5893_v25  ;;  %v5949_v45 = vadd.f32 %v1946_v19, %v1817_v52  ;;  %v1832_v58 = vpop.f32.mrf.mxu0  ;;  %v1948_v3 = vpop.f32.mrf.mxu1  ;;  %v5990_v9 = vsub.f32 %v2013_v4, %v5957_v59 }
 0x1b0   : > { %v5952_v43 = vsub.f32 %v2022_v28, %v5942_v51  ;;  %v2026_v24 = vsel %vm1994_vm4, %v1942_v37, %v2010_v56  ;;  %v1833_v15 = vadd.f32 %v1832_v58, %v5895_v53  ;;  %v5955_v62 = vadd.f32 %v1948_v3, %v1819_v8 }
 0x1b1   : > { %v5963_v7 = vsub.f32 %v2025_v50, %v5946_v47  ;;  %v5965_v25 = vand.u32 4294901760, %v2026_v24  ;;  %v1837_v52 = vpop.f32.mrf.mxu0  ;;  %v1953_v6 = vpop.f32.mrf.mxu1  ;;  %v2891_v18 = vand.u32 4294901760, %v5960_v13  ;;  %v2897_v4 = vand.u32 4294901760, %v5968_v40 }
 0x1b2   : > { %v1838_v63 = vadd.f32 %v1837_v52, %v5897_v49  ;;  %v5971_v53 = vadd.f32 %v1953_v6, %v1824_v30  ;;  %v2885_v8 = vand.u32 4294901760, %v5952_v43 }
 0x1b3   : > { %v5977_v32 = vsub.f32 %v2026_v24, %v5965_v25  ;;  %v1839_v16 = vpop.f32.mrf.mxu0  ;;  %v1955_v55 = vpop.f32.mrf.mxu1  ;;  %2755 = vmatprep.subr.mxu0 %v5965_v25  ;;  %v2879_v26 = vand.u32 4294901760, %v5963_v7  ;;  %v2892_v44 = vsub.f32 %v5960_v13, %v2891_v18  ;;  %v2898_v56 = vsub.f32 %v5968_v40, %v2897_v4 }
 0x1b4   : > { %v1840_v49 = vadd.f32 %v1839_v16, %v5901_v54  ;;  %v5986_v14 = vadd.f32 %v1955_v55, %v1826_v57  ;;  %2757 = vmatpush1.msra.mxu0 %v5946_v47  ;;  %v2886_v61 = vsub.f32 %v5952_v43, %v2885_v8  ;;  %v2909_v57 = vand.u32 4294901760, %v5983_v29 }
 0x1b5   : > { %v1844_v42 = vpop.f32.mrf.mxu0  ;;  %v1960_v60 = vpop.f32.mrf.mxu1  ;;  %2759 = vmatprep.subr.mxu0 %v5942_v51  ;;  %v2873_v30 = vand.u32 4294901760, %v5977_v32  ;;  %v2880_v54 = vsub.f32 %v5963_v7, %v2879_v26  ;;  %v2899_v16 = vand.u32 4294901760, %v2898_v56 }
 0x1b6   : > { %v1845_v48 = vadd.f32 %v1844_v42, %v5904_v20  ;;  %v5996_v31 = vadd.f32 %v1960_v60, %v1831_v1  ;;  %2761 = vmatpush1.msra.mxu0 %v5940_v12  ;;  %v2903_v20 = vand.u32 4294901760, %v5974_v10  ;;  %v2915_v1 = vand.u32 4294901760, %v5990_v9 }
 0x1b7   : > { %v1962_v27 = vpop.f32.mrf.mxu1  ;;  %2763 = vmatprep.subr.mxu0 %v5938_v41  ;;  %v2874_v2 = vsub.f32 %v5977_v32, %v2873_v30  ;;  %v2881_v50 = vand.u32 4294901760, %v2880_v54  ;;  %v2887_v3 = vand.u32 4294901760, %v2886_v61  ;;  %v2910_v52 = vsub.f32 %v5983_v29, %v2909_v57 }
 0x1b8   : > { %v6009_v11 = vadd.f32 %v1962_v27, %v1833_v15  ;;  %2765 = vmatpush1.msra.mxu0 %v5944_v5  ;;  %v2904_v24 = vsub.f32 %v5974_v10, %v2903_v20 }
 0x1b9   : > { %v1967_v37 = vpop.f32.mrf.mxu1  ;;  %2767 = vmatprep.subr.mxu0 %v5936_v21  ;;  %v2875_v28 = vand.u32 4294901760, %v2874_v2 }
 0x1ba   : > { %v6017_v19 = vadd.f32 %v1967_v37, %v1838_v63  ;;  %2769 = vmatpush1.msra.mxu0 %v5957_v59  ;;  %v2905_v55 = vand.u32 4294901760, %v2904_v24 }
 0x1bb   : > { %v1969_v58 = vpop.f32.mrf.mxu1  ;;  %2808 = vmatmul.mubr.f32.vlgmr.msra.gmra.mxu0 %v5654_v33  ;;  %2876 = vmatprep.subr.mxu1 %v2875_v28  ;;  %v2893_v33 = vand.u32 4294901760, %v2892_v44 }
 0x1bc   : > { %v6028_v15 = vadd.f32 %v1969_v58, %v1840_v49  ;;  %3006 = vmatprep.subr.mxu0 %v5977_v32  ;;  %2882 = vmatpush1.msra.mxu1 %v2881_v50  ;;  %v2916_v32 = vsub.f32 %v5990_v9, %v2915_v1  ;;  %v2911_v49 = vand.u32 4294901760, %v2910_v52 }
 0x1bd   : > { %3009 = vmatpush1.msra.mxu0 %v5963_v7  ;;  %v1974_v6 = vpop.f32.mrf.mxu1  ;;  %2888 = vmatprep.subr.mxu1 %v2887_v3 }
 0x1be   : > { %v6035_v63 = vadd.f32 %v1974_v6, %v1845_v48  ;;  %3012 = vmatprep.subr.mxu0 %v5952_v43  ;;  %2813 = vmatprep.mubr.f32.mxu0 %v6502_v17  ;;  %v2917_v42 = vand.u32 4294901760, %v2916_v32  ;;  %v6519_v43 = vld [vmem:[#allocation40_spill] sm:$0xff]  ;;  %v6524_v32 = vld [vmem:[#allocation7_spill] sm:$0xff] }
 0x1bf   : > { %2894 = vmatpush1.msra.mxu1 %v2893_v33  ;;  %3015 = vmatpush1.msra.mxu0 %v5960_v13 }
 0x1c0   : > { %6514 = vst [vmem:[#allocation53_spill] sm:$0xff] %v6035_v63  ;;  %2819 = vmatmul.mubr.f32.gmra.mxu0 %v5693_v38  ;;  %2900 = vmatprep.subr.mxu1 %v2899_v16  ;;  %v6516_v38 = vld [vmem:[#allocation41_spill] sm:$0xff] }
 0x1c1   : > { %3018 = vmatprep.subr.mxu0 %v5968_v40  ;;  %2906 = vmatpush1.msra.mxu1 %v2905_v55  ;;  %v6525_v55 = vld [vmem:[#allocation8_spill] sm:$0xff] }
 0x1c2   : > { %3021 = vmatpush1.msra.mxu0 %v5974_v10  ;;  %2912 = vmatprep.subr.mxu1 %v2911_v49  ;;  %v385_v49 = vadd.f32 %v6525_v55, %v6524_v32 }
 0x1c3   : > { %3024 = vmatprep.subr.mxu0 %v5983_v29  ;;  %2824 = vmatprep.mubr.f32.mxu0 %v6502_v17 }
 0x1c4   : > { %2918 = vmatpush1.msra.mxu1 %v2917_v42  ;;  %3027 = vmatpush1.msra.mxu0 %v5990_v9  ;;  %v6526_v42 = vld [vmem:[#allocation9_spill] sm:$0xff] }
 0x1c5   : > { %2830 = vmatmul.mubr.f32.gmra.mxu0 %v5717_v23  ;;  %2953 = vmatmul.mubr.f32.vlgmr.msra.gmra.mxu1 %v5498_v46  ;;  %v6517_v23 = vld [vmem:[#allocation30_spill] sm:$0xff] }
 0x1c6   : > { %3118 = vmatprep.subr.mxu1 %v5965_v25  ;;  %3229 = vmatprep.subr.mxu0 %v2873_v30 }
 0x1c7   : > { %3120 = vmatpush1.msra.mxu1 %v5946_v47  ;;  %2835 = vmatprep.mubr.f32.mxu0 %v6502_v17 }
 0x1c8   : > { %3122 = vmatprep.subr.mxu1 %v5942_v51  ;;  %2958 = vmatprep.mubr.f32.mxu1 %v6502_v17 }
 0x1c9   : > { %3124 = vmatpush1.msra.mxu1 %v5940_v12  ;;  %2841 = vmatmul.mubr.f32.gmra.mxu0 %v5732_v39  ;;  %v6518_v39 = vld [vmem:[#allocation46_spill] sm:$0xff] }
 0x1ca   : > { %2960 = vmatmul.mubr.f32.gmra.mxu1 %v5536_v35  ;;  %3126 = vmatprep.subr.mxu1 %v5938_v41 }
 0x1cb   : > { %3128 = vmatpush1.msra.mxu1 %v5944_v5  ;;  %2965 = vmatprep.mubr.f32.mxu1 %v6502_v17 }
 0x1cc   : > { %3130 = vmatprep.subr.mxu1 %v5936_v21  ;;  %3060 = vmatprep.mubr.f32.mxu0 %v6502_v17 }
 0x1cd   : > { %3132 = vmatpush1.msra.mxu1 %v5957_v59  ;;  %3063 = vmatmul.mubr.f32.vlgmr.msra.gmra.mxu0 %v5510_v34  ;;  %v6515_v34 = vld [vmem:[#allocation31_spill] sm:$0xff] }
 0x1ce   : > { %2967 = vmatmul.mubr.f32.gmra.mxu1 %v5588_v22  ;;  %3233 = vmatpush1.msra.mxu0 %v2879_v26 }
 0x1cf   : > { %3344 = vmatprep.subr.mxu1 %v5965_v25  ;;  %3237 = vmatprep.subr.mxu0 %v2885_v8 }
 0x1d0   : > { %3241 = vmatpush1.msra.mxu0 %v2891_v18  ;;  %2972 = vmatprep.mubr.f32.mxu1 %v6502_v17 }
 0x1d1   : > { %3068 = vmatprep.mubr.f32.mxu0 %v6502_v17  ;;  %3245 = vmatprep.subr.mxu0 %v2897_v4 }
 0x1d2   : > { %2974 = vmatmul.mubr.f32.gmra.mxu1 %v5636_v0  ;;  %3071 = vmatmul.mubr.f32.gmra.mxu0 %v6515_v34  ;;  %v6527_v34 = vld [vmem:[#allocation10_spill] sm:$0xff] }
 0x1d3   : > { %3249 = vmatpush1.msra.mxu0 %v2903_v20  ;;  %3076 = vmatprep.mubr.f32.mxu0 %v6502_v17 }
 0x1d4   : > { %3253 = vmatprep.subr.mxu0 %v2909_v57  ;;  %3165 = vmatprep.mubr.f32.mxu1 %v6502_v17 }
 0x1d5   : > { %3257 = vmatpush1.msra.mxu0 %v2915_v1 }
 0x1d6   : > { %3079 = vmatmul.mubr.f32.gmra.mxu0 %v6516_v38  ;;  %3169 = vmatmul.mubr.f32.vlgmr.msra.gmra.mxu1 %v6517_v23  ;;  %v396_v38 = vadd.f32 %v6527_v34, %v6526_v42  ;;  %v6539_v42 = vld [vmem:[#allocation23_spill] sm:$0xff] }
 0x1d7   : > { %3346 = vmatpush1.msra.mxu1 %v5946_v47  ;;  %3084 = vmatprep.mubr.f32.mxu0 %v6502_v17 }
 0x1d8   : > { %3348 = vmatprep.subr.mxu1 %v5942_v51  ;;  %3174 = vmatprep.mubr.f32.mxu1 %v6502_v17  ;;  %v6520_v51 = vld [vmem:[#allocation45_spill] sm:$0xff] }
 0x1d9   : > { %3350 = vmatpush1.msra.mxu1 %v5940_v12 }
 0x1da   : > { %3352 = vmatprep.subr.mxu1 %v5938_v41  ;;  %3087 = vmatmul.mubr.f32.gmra.mxu0 %v6518_v39  ;;  %v6521_v41 = vld [vmem:[#allocation49_spill] sm:$0xff] }
 0x1db   : > { %3178 = vmatmul.mubr.f32.gmra.mxu1 %v6519_v43  ;;  %3290 = vmatprep.mubr.f32.mxu0 %v6502_v17  ;;  %v6528_v43 = vld [vmem:[#allocation5_spill] sm:$0xff] }
 0x1dc   : > { %3354 = vmatpush1.msra.mxu1 %v5944_v5  ;;  %3183 = vmatprep.mubr.f32.mxu1 %v6502_v17 }
 0x1dd   : > { %3356 = vmatprep.subr.mxu1 %v5936_v21 }
 0x1de   : > { %3358 = vmatpush1.msra.mxu1 %v5957_v59  ;;  %3292 = vmatmul.mubr.f32.vlgmr.msra.gmra.mxu0 %v5498_v46  ;;  %v6125_v59 = vpop.f32.mrf.mxu1 }
 0x1df   : > { %3187 = vmatmul.mubr.f32.gmra.mxu1 %v6520_v51  ;;  %3297 = vmatprep.mubr.f32.mxu0 %v6502_v17  ;;  %6523 = vst [vmem:[#allocation41_spill] sm:$0xff] %v6125_v59  ;;  %v6529_v51 = vld [vmem:[#allocation11_spill] sm:$0xff] }
 0x1e0   : > { %3192 = vmatprep.mubr.f32.mxu1 %v6502_v17 }
 0x1e2   : > { %3299 = vmatmul.mubr.f32.gmra.mxu0 %v5536_v35 }
 0x1e3   : > { %3196 = vmatmul.mubr.f32.gmra.mxu1 %v6521_v41  ;;  %3304 = vmatprep.mubr.f32.mxu0 %v6502_v17  ;;  %v407_v41 = vadd.f32 %v6529_v51, %v6528_v43  ;;  %v6540_v43 = vld [vmem:[#allocation24_spill] sm:$0xff] }
 0x1e4   : > { %3391 = vmatprep.mubr.f32.mxu1 %v6502_v17 }
 0x1e6   : > { %3306 = vmatmul.mubr.f32.gmra.mxu0 %v5588_v22 }
 0x1e7   : > { %3393 = vmatmul.mubr.f32.vlgmr.msra.gmra.mxu1 %v5498_v46  ;;  %3311 = vmatprep.mubr.f32.mxu0 %v6502_v17  ;;  %v6123_v46 = vpop.f32.mrf.mxu0 }
 0x1e8   : > { %3398 = vmatprep.mubr.f32.mxu1 %v6502_v17  ;;  %6522 = vst [vmem:[#allocation31_spill] sm:$0xff] %v6123_v46 }
 0x1ea   : > { %3313 = vmatmul.mubr.f32.gmra.mxu0 %v5636_v0 }
 0x1eb   : > { %3400 = vmatmul.mubr.f32.gmra.mxu1 %v5536_v35  ;;  %3599 = vmatprep.mubr.f32.mxu0 %v6502_v17 }
 0x1ec   : > { %3405 = vmatprep.mubr.f32.mxu1 %v6502_v17 }
 0x1ef   : > { %3407 = vmatmul.mubr.f32.gmra.mxu1 %v5588_v22 }
 0x1f0   : > { %3412 = vmatprep.mubr.f32.mxu1 %v6502_v17 }
 0x1f3   : > { %3414 = vmatmul.mubr.f32.gmra.mxu1 %v5636_v0 }
 0x1f4   : > { %3715 = vmatprep.mubr.f32.mxu1 %v6502_v17 }
 0x20f   : > { %v2119_v21 = vpop.f32.mrf.mxu0 }
 0x211   : > { %v2121_v12 = vpop.f32.mrf.mxu0 }
 0x214   : > { %v2130_v5 = vpop.f32.mrf.mxu0 }
 0x216   : > { %v2132_v47 = vpop.f32.mrf.mxu0 }
 0x219   : > { %v2264_v35 = vpop.f32.mrf.mxu1  ;;  %v2141_v13 = vpop.f32.mrf.mxu0 }
 0x21a   : > { %v2265_v57 = vadd.f32 %v2264_v35, %v2119_v21  ;;  %v6530_v35 = vld [vmem:[#allocation12_spill] sm:$0xff] }
 0x21b   : > { %v2266_v7 = vpop.f32.mrf.mxu1  ;;  %v2143_v25 = vpop.f32.mrf.mxu0 }
 0x21c   : > { %v2267_v37 = vadd.f32 %v2266_v7, %v2121_v12  ;;  %v6531_v7 = vld [vmem:[#allocation6_spill] sm:$0xff] }
 0x21d   : > { %v2152_v40 = vpop.f32.mrf.mxu0 }
 0x21e   : > { %v2271_v22 = vpop.f32.mrf.mxu1 }
 0x21f   : > { %v2154_v10 = vpop.f32.mrf.mxu0  ;;  %v2272_v61 = vadd.f32 %v2271_v22, %v2130_v5 }
 0x220   : > { %v2273_v26 = vpop.f32.mrf.mxu1 }
 0x221   : > { %v2374_v8 = vpop.f32.mrf.mxu0  ;;  %v2274_v50 = vadd.f32 %v2273_v26, %v2132_v47 }
 0x222   : > { %v2278_v0 = vpop.f32.mrf.mxu1  ;;  %v2375_v24 = vadd.f32 %v2374_v8, %v2265_v57 }
 0x223   : > { %v2376_v9 = vpop.f32.mrf.mxu0  ;;  %v2279_v1 = vadd.f32 %v2278_v0, %v2141_v13  ;;  %v539_v13 = vadd.f32 %v6530_v35, %v385_v49 }
 0x224   : > { %v2280_v29 = vpop.f32.mrf.mxu1  ;;  %v2377_v52 = vadd.f32 %v2376_v9, %v2267_v37  ;;  %v6535_v37 = vld [vmem:[#allocation18_spill] sm:$0xff] }
 0x225   : > { %v2281_v33 = vadd.f32 %v2280_v29, %v2143_v25  ;;  %v6532_v25 = vld [vmem:[#allocation13_spill] sm:$0xff]  ;;  %v6533_v29 = vld [vmem:[#allocation14_spill] sm:$0xff] }
 0x226   : > { %v2285_v60 = vpop.f32.mrf.mxu1  ;;  %v418_v22 = vadd.f32 %v6532_v25, %v6531_v7  ;;  %v546_v9 = vadd.f32 %v6533_v29, %v396_v38 }
 0x227   : > { %v2286_v21 = vadd.f32 %v2285_v60, %v2152_v40  ;;  %v6536_v40 = vld [vmem:[#allocation20_spill] sm:$0xff] }
 0x228   : > { %v2287_v30 = vpop.f32.mrf.mxu1  ;;  %v676_v60 = vadd.f32 %v6536_v40, %v539_v13  ;;  %v6543_v13 = vld [vmem:[#allocation32_spill] sm:$0xff] }
 0x229   : > { %v2382_v18 = vpop.f32.mrf.mxu0 }
 0x22a   : > { %v2480_v48 = vpop.f32.mrf.mxu1  ;;  %v2383_v58 = vadd.f32 %v2382_v18, %v2272_v61  ;;  %v6534_v18 = vld [vmem:[#allocation17_spill] sm:$0xff]  ;;  %v820_v34 = vadd.f32 %v6539_v42, %v676_v60 }
 0x22b   : > { %v2384_v54 = vpop.f32.mrf.mxu0  ;;  %v2481_v26 = vadd.f32 %v2480_v48, %v2375_v24  ;;  %v6538_v24 = vld [vmem:[#allocation22_spill] sm:$0xff] }
 0x22c   : > { %v2482_v4 = vpop.f32.mrf.mxu1  ;;  %v2385_v23 = vadd.f32 %v2384_v54, %v2274_v50  ;;  %v553_v54 = vadd.f32 %v6534_v18, %v407_v41  ;;  %v560_v50 = vadd.f32 %v6535_v37, %v418_v22  ;;  %v6541_v41 = vld [vmem:[#allocation25_spill] sm:$0xff]  ;;  %v6548_v37 = vld [vmem:[#allocation39_spill] sm:$0xff] }
 0x22d   : > { %v2390_v27 = vpop.f32.mrf.mxu0  ;;  %v2483_v8 = vadd.f32 %v2482_v4, %v2377_v52 }
 0x22e   : > { %v2489_v2 = vpop.f32.mrf.mxu1  ;;  %v2391_v5 = vadd.f32 %v2390_v27, %v2279_v1  ;;  %v2288_v27 = vadd.f32 %v2287_v30, %v2154_v10  ;;  %v692_v52 = vadd.f32 %v6538_v24, %v553_v54  ;;  %v700_v51 = vadd.f32 %v6540_v43, %v560_v50  ;;  %v6546_v54 = vld [vmem:[#allocation35_spill] sm:$0xff] }
 0x22f   : > { %v2392_v20 = vpop.f32.mrf.mxu0  ;;  %v2490_v12 = vadd.f32 %v2489_v2, %v2383_v58  ;;  %v6537_v58 = vld [vmem:[#allocation21_spill] sm:$0xff] }
 0x230   : > { %v2491_v28 = vpop.f32.mrf.mxu1  ;;  %v2393_v61 = vadd.f32 %v2392_v20, %v2281_v33  ;;  %v684_v32 = vadd.f32 %v6537_v58, %v546_v9 }
 0x231   : > { %v2398_v44 = vpop.f32.mrf.mxu0  ;;  %v2492_v2 = vadd.f32 %v2491_v28, %v2385_v23  ;;  %v6542_v28 = vld [vmem:[#allocation27_spill] sm:$0xff] }
 0x232   : > { %v2498_v56 = vpop.f32.mrf.mxu1  ;;  %v2399_v49 = vadd.f32 %v2398_v44, %v2286_v21  ;;  %v829_v35 = vadd.f32 %v6541_v41, %v684_v32  ;;  %v838_v23 = vadd.f32 %v6542_v28, %v692_v52  ;;  %v6551_v52 = vld [vmem:[#allocation44_spill] sm:$0xff]  ;;  %v6554_v41 = vld [vmem:[#allocation42_spill] sm:$0xff] }
 0x233   : > { %v2400_v3 = vpop.f32.mrf.mxu0  ;;  %v2499_v55 = vadd.f32 %v2498_v56, %v2391_v5  ;;  %v962_v56 = vadd.f32 %v6543_v13, %v820_v34  ;;  %v6544_v5 = vld [vmem:[#allocation33_spill] sm:$0xff]  ;;  %v6552_v34 = vld [vmem:[#allocation34_spill] sm:$0xff] }
 0x234   : > { %v2500_v6 = vpop.f32.mrf.mxu1  ;;  %v2401_v44 = vadd.f32 %v2400_v3, %v2288_v27  ;;  %v969_v7 = vadd.f32 %v6544_v5, %v829_v35  ;;  %v6547_v3 = vld [vmem:[#allocation36_spill] sm:$0xff]  ;;  %v6549_v27 = vld [vmem:[#allocation37_spill] sm:$0xff] }
 0x235   : > { %v2603_v16 = vpop.f32.mrf.mxu0  ;;  %v2501_v10 = vadd.f32 %v2500_v6, %v2393_v61  ;;  %v976_v61 = vadd.f32 %v6546_v54, %v838_v23 }
 0x236   : > { %v2507_v39 = vpop.f32.mrf.mxu1  ;;  %v2604_v38 = vadd.f32 %v2603_v16, %v2481_v26  ;;  %v187_v26 = vld [vmem:[%s6429_s2 + $0x20] sm:$0x1]  ;;  %v1099_v50 = vadd.f32 %v6548_v37, %v969_v7 }
 0x237   : > { %v2605_v47 = vpop.f32.mrf.mxu0  ;;  %v2508_v25 = vadd.f32 %v2507_v39, %v2399_v49  ;;  %v6550_v49 = vld [vmem:[#allocation38_spill] sm:$0xff]  ;;  %v1106_v42 = vadd.f32 %v6551_v52, %v976_v61 }
 0x238   : > { %v2509_v0 = vpop.f32.mrf.mxu1  ;;  %v2606_v20 = vadd.f32 %v2605_v47, %v2483_v8  ;;  %v6545_v8 = vld [vmem:[#allocation28_spill] sm:$0xff] }
 0x239   : > { %v2610_v57 = vpop.f32.mrf.mxu0  ;;  %v847_v6 = vadd.f32 %v6545_v8, %v700_v51  ;;  %v2510_v60 = vadd.f32 %v2509_v0, %v2401_v44  ;;  %v6553_v51 = vld [vmem:[#allocation48_spill] sm:$0xff] }
 0x23a   : > { %v2704_v1 = vpop.f32.mrf.mxu1  ;;  %v2611_v48 = vadd.f32 %v2610_v57, %v2490_v12  ;;  %v1092_v57 = vadd.f32 %v6547_v3, %v962_v56 }
 0x23b   : > { %v2612_v4 = vpop.f32.mrf.mxu0  ;;  %v2705_v29 = vadd.f32 %v2704_v1, %v2604_v38 }
 0x23c   : > { %v2706_v33 = vpop.f32.mrf.mxu1  ;;  %v2613_v21 = vadd.f32 %v2612_v4, %v2492_v2 }
 0x23d   : > { %v2617_v30 = vpop.f32.mrf.mxu0  ;;  %v2707_v9 = vadd.f32 %v2706_v33, %v2606_v20  ;;  %v3420_v38 = vadd.f32 %v2705_v29, %v6552_v34 }
 0x23e   : > { %v2711_v12 = vpop.f32.mrf.mxu1  ;;  %v2618_v16 = vadd.f32 %v2617_v30, %v2499_v55  ;;  %v3525_v55 = vsel %vm2027_vm2, %v187_v26, 0 }
 0x23f   : > { %v2712_v22 = vadd.f32 %v2711_v12, %v2611_v48  ;;  %v2619_v47 = vpop.f32.mrf.mxu0  ;;  %v983_v48 = vadd.f32 %v6550_v49, %v847_v6  ;;  %v3421_v20 = vadd.f32 %v2707_v9, %v1092_v57  ;;  %v6162_v30 = vand.u32 4294901760, %v3525_v55 }
 0x240   : > { %v2713_v18 = vpop.f32.mrf.mxu1  ;;  %v2620_v40 = vadd.f32 %v2619_v47, %v2501_v10  ;;  %v3452_v5 = vmul.f32 0.01, %v3420_v38  ;;  %v6555_v47 = vld [vmem:[#allocation47_spill] sm:$0xff]  ;;  %vm3436_vm9 = vcmp.gt.f32.partialorder %v3420_v38, 0.0 }
 0x241   : > { %v2624_v39 = vpop.f32.mrf.mxu0  ;;  %v3424_v2 = vadd.f32 %v2712_v22, %v6549_v27  ;;  %v2714_v58 = vadd.f32 %v2713_v18, %v2613_v21  ;;  %v1113_v0 = vadd.f32 %v6553_v51, %v983_v48  ;;  %vm3437_vm6 = vcmp.gt.f32.partialorder %v3421_v20, 0.0 }
 0x242   : > { %v2718_v32 = vpop.f32.mrf.mxu1  ;;  %v2625_v4 = vadd.f32 %v2624_v39, %v2508_v25  ;;  %v3453_v7 = vmul.f32 0.01, %v3421_v20  ;;  %v6167_v29 = vsub.f32 %v3525_v55, %v6162_v30 }
 0x243   : > { %v2719_v1 = vadd.f32 %v2718_v32, %v2618_v16  ;;  %v2626_v24 = vpop.f32.mrf.mxu0  ;;  %v3425_v33 = vadd.f32 %v2714_v58, %v1099_v50  ;;  %v3456_v28 = vmul.f32 0.01, %v3424_v2  ;;  %vm3440_vm7 = vcmp.gt.f32.partialorder %v3424_v2, 0.0 }
 0x244   : > { %v2720_v43 = vpop.f32.mrf.mxu1  ;;  %v2627_v13 = vadd.f32 %v2626_v24, %v2510_v60  ;;  %6556 = vst [vmem:[#allocation30_spill] sm:$0xff] %v6167_v29  ;;  %v3469_v61 = vsel %vm3437_vm6, %v3421_v20, %v3453_v7  ;;  %v3468_v50 = vsel %vm3436_vm9, %v3420_v38, %v3452_v5  ;;  %v6183_v32 = vand.u32 4294901760, %v6167_v29 }
 0x245   : > { %v3428_v35 = vadd.f32 %v2719_v1, %v6554_v41  ;;  %v2721_v10 = vadd.f32 %v2720_v43, %v2620_v40  ;;  %vm3441_vm2 = vcmp.gt.f32.partialorder %v3425_v33, 0.0  ;;  %v3457_v23 = vmul.f32 0.01, %v3425_v33 }
 0x246   : > { %v2725_v56 = vpop.f32.mrf.mxu1  ;;  %v3472_v9 = vsel %vm3440_vm7, %v3424_v2, %v3456_v28  ;;  %v6180_v2 = vand.u32 4294901760, %v3469_v61  ;;  %6557 = vst [vmem:[#allocation46_spill] sm:$0xff] %v6183_v32  ;;  %v6188_v48 = vand.u32 4294901760, %v3468_v50  ;;  %v3603_v43 = vsub.f32 %v6167_v29, %v6183_v32 }
 0x247   : > { %vm3444_vm5 = vcmp.gt.f32.partialorder %v3428_v35, 0.0  ;;  %v3460_v44 = vmul.f32 0.01, %v3428_v35  ;;  %v3429_v21 = vadd.f32 %v2721_v10, %v1106_v42  ;;  %v2726_v12 = vadd.f32 %v2725_v56, %v2625_v4 }
 0x248   : > { %v2727_v25 = vpop.f32.mrf.mxu1  ;;  %v3473_v8 = vsel %vm3441_vm2, %v3425_v33, %v3457_v23  ;;  %v6178_v58 = vand.u32 4294901760, %v3472_v9  ;;  %v6209_v33 = vsub.f32 %v3469_v61, %v6180_v2 }
 0x249   : > { %v3476_v22 = vsel %vm3444_vm5, %v3428_v35, %v3460_v44  ;;  %vm3445_vm8 = vcmp.gt.f32.partialorder %v3429_v21, 0.0  ;;  %v3461_v16 = vmul.f32 0.01, %v3429_v21  ;;  %v3432_v26 = vadd.f32 %v2726_v12, %v6555_v47 }
 0x24a   : > { %v2728_v6 = vadd.f32 %v2727_v25, %v2627_v13  ;;  %v6172_v37 = vand.u32 4294901760, %v3476_v22  ;;  %v6174_v39 = vand.u32 4294901760, %v3473_v8  ;;  %v6203_v34 = vsub.f32 %v3472_v9, %v6178_v58 }
 0x24b   : > { %v3477_v18 = vsel %vm3445_vm8, %v3429_v21, %v3461_v16  ;;  %vm3448_vm10 = vcmp.gt.f32.partialorder %v3432_v26, 0.0  ;;  %v3464_v54 = vmul.f32 0.01, %v3432_v26  ;;  %v3673_v56 = vand.u32 4294901760, %v6209_v33 }
 0x24c   : > { %v3433_v3 = vadd.f32 %v2728_v6, %v1113_v0  ;;  %v6170_v57 = vand.u32 4294901760, %v3477_v18  ;;  %v6194_v4 = vsub.f32 %v3476_v22, %v6172_v37  ;;  %v6199_v52 = vsub.f32 %v3473_v8, %v6174_v39 }
 0x24d   : > { %v3480_v40 = vsel %vm3448_vm10, %v3432_v26, %v3464_v54  ;;  %v6216_v0 = vsub.f32 %v3468_v50, %v6188_v48  ;;  %v3667_v28 = vand.u32 4294901760, %v6203_v34  ;;  %v6227_v44 = vand.u32 4294901760, %v3603_v43 }
 0x24e   : > { %vm3449_vm11 = vcmp.gt.f32.partialorder %v3433_v3, 0.0  ;;  %v3465_v60 = vmul.f32 0.01, %v3433_v3  ;;  %v6176_v27 = vand.u32 4294901760, %v3480_v40  ;;  %v6186_v55 = vsub.f32 %v3477_v18, %v6170_v57 }
 0x24f   : > { %v3655_v51 = vand.u32 4294901760, %v6194_v4  ;;  %v3661_v35 = vand.u32 4294901760, %v6199_v52  ;;  %v3679_v12 = vand.u32 4294901760, %v6216_v0  ;;  %v3668_v22 = vsub.f32 %v6203_v34, %v3667_v28 }
 0x250   : > { %v3481_v49 = vsel %vm3449_vm11, %v3433_v3, %v3465_v60  ;;  %v6191_v1 = vsub.f32 %v3480_v40, %v6176_v27  ;;  %v3649_v20 = vand.u32 4294901760, %v6186_v55  ;;  %v3674_v47 = vsub.f32 %v6209_v33, %v3673_v56 }
 0x251   : > { %v6196_v24 = vand.u32 4294901760, %v3481_v49  ;;  %v3656_v21 = vsub.f32 %v6194_v4, %v3655_v51  ;;  %v3662_v7 = vsub.f32 %v6199_v52, %v3661_v35  ;;  %v3680_v8 = vsub.f32 %v6216_v0, %v3679_v12 }
 0x252   : > { %v3643_v42 = vand.u32 4294901760, %v6191_v1  ;;  %v3650_v13 = vsub.f32 %v6186_v55, %v3649_v20  ;;  %v3669_v9 = vand.u32 4294901760, %v3668_v22  ;;  %v3675_v18 = vand.u32 4294901760, %v3674_v47 }
 0x253   : > { %3552 = vmatprep.subr.mxu0 %v6196_v24  ;;  %v3636_v38 = vsub.f32 %v3481_v49, %v6196_v24  ;;  %v3657_v26 = vand.u32 4294901760, %v3656_v21  ;;  %v3663_v6 = vand.u32 4294901760, %v3662_v7  ;;  %v3681_v54 = vand.u32 4294901760, %v3680_v8 }
 0x254   : > { %3554 = vmatpush1.msra.mxu0 %v6176_v27  ;;  %v3644_v10 = vsub.f32 %v6191_v1, %v3643_v42  ;;  %v3651_v16 = vand.u32 4294901760, %v3650_v13 }
 0x255   : > { %3556 = vmatprep.subr.mxu0 %v6170_v57  ;;  %v3637_v41 = vand.u32 4294901760, %v3636_v38 }
 0x256   : > { %3558 = vmatpush1.msra.mxu0 %v6172_v37  ;;  %v3645_v25 = vand.u32 4294901760, %v3644_v10 }
 0x257   : > { %3560 = vmatprep.subr.mxu0 %v6174_v39  ;;  %v3638_v23 = vsub.f32 %v3636_v38, %v3637_v41 }
 0x258   : > { %3562 = vmatpush1.msra.mxu0 %v6178_v58 }
 0x259   : > { %3564 = vmatprep.subr.mxu0 %v6180_v2  ;;  %v3639_v5 = vand.u32 4294901760, %v3638_v23 }
 0x25a   : > { %3566 = vmatpush1.msra.mxu0 %v6188_v48 }
 0x25b   : > { %3640 = vmatprep.subr.mxu1 %v3639_v5  ;;  %3749 = vmatprep.subr.mxu0 %v3636_v38 }
 0x25c   : > { %3605 = vmatmul.mubr.f32.vlgmr.msra.gmra.mxu0 %v6227_v44  ;;  %3646 = vmatpush1.msra.mxu1 %v3645_v25 }
 0x25d   : > { %3752 = vmatpush1.msra.mxu0 %v6191_v1  ;;  %3652 = vmatprep.subr.mxu1 %v3651_v16 }
 0x25e   : > { %3755 = vmatprep.subr.mxu0 %v6186_v55  ;;  %3658 = vmatpush1.msra.mxu1 %v3657_v26 }
 0x25f   : > { %3758 = vmatpush1.msra.mxu0 %v6194_v4  ;;  %3664 = vmatprep.subr.mxu1 %v3663_v6 }
 0x260   : > { %3761 = vmatprep.subr.mxu0 %v6199_v52  ;;  %3670 = vmatpush1.msra.mxu1 %v3669_v9 }
 0x261   : > { %3764 = vmatpush1.msra.mxu0 %v6203_v34  ;;  %3676 = vmatprep.subr.mxu1 %v3675_v18 }
 0x262   : > { %3767 = vmatprep.subr.mxu0 %v6209_v33  ;;  %3682 = vmatpush1.msra.mxu1 %v3681_v54 }
 0x263   : > { %3770 = vmatpush1.msra.mxu0 %v6216_v0  ;;  %3803 = vmatprep.mubr.f32.mxu0 %v6502_v17 }
 0x264   : > { %3837 = vmatprep.subr.mxu1 %v6196_v24  ;;  %3921 = vmatprep.subr.mxu0 %v3637_v41 }
 0x265   : > { %3717 = vmatmul.mubr.f32.vlgmr.msra.gmra.mxu1 %v6162_v30  ;;  %3806 = vmatmul.mubr.f32.vlgmr.msra.gmra.mxu0 %v6167_v29 }
 0x266   : > { %3839 = vmatpush1.msra.mxu1 %v6176_v27  ;;  %3925 = vmatpush1.msra.mxu0 %v3643_v42 }
 0x267   : > { %3841 = vmatprep.subr.mxu1 %v6170_v57  ;;  %3929 = vmatprep.subr.mxu0 %v3649_v20 }
 0x268   : > { %3843 = vmatpush1.msra.mxu1 %v6172_v37  ;;  %3933 = vmatpush1.msra.mxu0 %v3655_v51 }
 0x269   : > { %3845 = vmatprep.subr.mxu1 %v6174_v39  ;;  %3937 = vmatprep.subr.mxu0 %v3661_v35 }
 0x26a   : > { %3847 = vmatpush1.msra.mxu1 %v6178_v58  ;;  %3941 = vmatpush1.msra.mxu0 %v3667_v28 }
 0x26b   : > { %3849 = vmatprep.subr.mxu1 %v6180_v2  ;;  %3945 = vmatprep.subr.mxu0 %v3673_v56 }
 0x26c   : > { %3851 = vmatpush1.msra.mxu1 %v6188_v48  ;;  %3949 = vmatpush1.msra.mxu0 %v3679_v12 }
 0x26d   : > { %3884 = vmatprep.mubr.f32.mxu1 %v6502_v17  ;;  %4015 = vmatprep.subr.mxu1 %v6196_v24 }
 0x26e   : > { %3888 = vmatmul.mubr.f32.vlgmr.msra.gmra.mxu1 %v6183_v32  ;;  %3982 = vmatprep.mubr.f32.mxu0 %v6502_v17 }
 0x26f   : > { %4017 = vmatpush1.msra.mxu1 %v6176_v27  ;;  %3984 = vmatmul.mubr.f32.vlgmr.msra.gmra.mxu0 %v6162_v30 }
 0x270   : > { %4019 = vmatprep.subr.mxu1 %v6170_v57  ;;  %4062 = vmatprep.mubr.f32.mxu1 %v6502_v17 }
 0x271   : > { %4021 = vmatpush1.msra.mxu1 %v6172_v37  ;;  %4142 = vmatprep.mubr.f32.mxu0 %v6502_v17 }
 0x272   : > { %4023 = vmatprep.subr.mxu1 %v6174_v39 }
 0x273   : > { %4025 = vmatpush1.msra.mxu1 %v6178_v58 }
 0x274   : > { %4027 = vmatprep.subr.mxu1 %v6180_v2 }
 0x275   : > { %4029 = vmatpush1.msra.mxu1 %v6188_v48 }
 0x276   : > { %4064 = vmatmul.mubr.f32.vlgmr.msra.gmra.mxu1 %v6162_v30 }
 0x277   : > { %4258 = vmatprep.mubr.f32.mxu1 %v6502_v17 }
 0x27b   : > { %v2809_v61 = vpop.f32.mrf.mxu0 }
 0x27d   : > { %v2811_v3 = vpop.f32.mrf.mxu0 }
 0x280   : > { %v2820_v57 = vpop.f32.mrf.mxu0 }
 0x282   : > { %v2822_v50 = vpop.f32.mrf.mxu0 }
 0x285   : > { %v2831_v40 = vpop.f32.mrf.mxu0  ;;  %v2954_v37 = vpop.f32.mrf.mxu1 }
 0x286   : > { %v2955_v56 = vadd.f32 %v2954_v37, %v2809_v61 }
 0x287   : > { %v2833_v60 = vpop.f32.mrf.mxu0  ;;  %v2956_v27 = vpop.f32.mrf.mxu1 }
 0x288   : > { %v2957_v22 = vadd.f32 %v2956_v27, %v2811_v3 }
 0x289   : > { %v2842_v55 = vpop.f32.mrf.mxu0 }
 0x28a   : > { %v2961_v39 = vpop.f32.mrf.mxu1 }
 0x28b   : > { %v2844_v49 = vpop.f32.mrf.mxu0  ;;  %v2962_v5 = vadd.f32 %v2961_v39, %v2820_v57 }
 0x28c   : > { %v2963_v58 = vpop.f32.mrf.mxu1 }
 0x28d   : > { %v3064_v1 = vpop.f32.mrf.mxu0  ;;  %v2964_v6 = vadd.f32 %v2963_v58, %v2822_v50 }
 0x28e   : > { %v2968_v2 = vpop.f32.mrf.mxu1  ;;  %v3065_v7 = vadd.f32 %v3064_v1, %v2955_v56 }
 0x28f   : > { %v3066_v4 = vpop.f32.mrf.mxu0  ;;  %v2969_v54 = vadd.f32 %v2968_v2, %v2831_v40 }
 0x290   : > { %v2970_v48 = vpop.f32.mrf.mxu1  ;;  %v3067_v9 = vadd.f32 %v3066_v4, %v2957_v22 }
 0x291   : > { %v2971_v61 = vadd.f32 %v2970_v48, %v2833_v60 }
 0x292   : > { %v2975_v24 = vpop.f32.mrf.mxu1  ;;  %v3072_v52 = vpop.f32.mrf.mxu0 }
 0x293   : > { %v3073_v47 = vadd.f32 %v3072_v52, %v2962_v5  ;;  %v2976_v52 = vadd.f32 %v2975_v24, %v2842_v55 }
 0x294   : > { %v2977_v42 = vpop.f32.mrf.mxu1  ;;  %v3074_v34 = vpop.f32.mrf.mxu0 }
 0x295   : > { %v3075_v46 = vadd.f32 %v3074_v34, %v2964_v6  ;;  %v2978_v48 = vadd.f32 %v2977_v42, %v2844_v49 }
 0x296   : > { %v3080_v38 = vpop.f32.mrf.mxu0  ;;  %v3170_v20 = vpop.f32.mrf.mxu1 }
 0x297   : > { %v3171_v26 = vadd.f32 %v3170_v20, %v3065_v7  ;;  %v3081_v37 = vadd.f32 %v3080_v38, %v2969_v54 }
 0x298   : > { %v3082_v33 = vpop.f32.mrf.mxu0  ;;  %v3172_v43 = vpop.f32.mrf.mxu1 }
 0x299   : > { %v3173_v36 = vadd.f32 %v3172_v43, %v3067_v9  ;;  %v3083_v20 = vadd.f32 %v3082_v33, %v2971_v61 }
 0x29a   : > { %v3088_v51 = vpop.f32.mrf.mxu0 }
 0x29b   : > { %v3179_v0 = vpop.f32.mrf.mxu1  ;;  %v3089_v2 = vadd.f32 %v3088_v51, %v2976_v52 }
 0x29c   : > { %v3090_v41 = vpop.f32.mrf.mxu0  ;;  %v3180_v63 = vadd.f32 %v3179_v0, %v3073_v47 }
 0x29d   : > { %v3181_v35 = vpop.f32.mrf.mxu1  ;;  %v3091_v24 = vadd.f32 %v3090_v41, %v2978_v48 }
 0x29e   : > { %v3293_v10 = vpop.f32.mrf.mxu0  ;;  %v3182_v1 = vadd.f32 %v3181_v35, %v3075_v46 }
 0x29f   : > { %v3188_v28 = vpop.f32.mrf.mxu1  ;;  %v3294_v59 = vadd.f32 %v3293_v10, %v3171_v26 }
 0x2a0   : > { %v3295_v23 = vpop.f32.mrf.mxu0  ;;  %v3189_v56 = vadd.f32 %v3188_v28, %v3081_v37 }
 0x2a1   : > { %v3190_v13 = vpop.f32.mrf.mxu1  ;;  %v3296_v3 = vadd.f32 %v3295_v23, %v3173_v36 }
 0x2a2   : > { %v3300_v21 = vpop.f32.mrf.mxu0  ;;  %v3191_v0 = vadd.f32 %v3190_v13, %v3083_v20 }
 0x2a3   : > { %v3197_v12 = vpop.f32.mrf.mxu1  ;;  %v3301_v29 = vadd.f32 %v3300_v21, %v3180_v63 }
 0x2a4   : > { %v3302_v25 = vpop.f32.mrf.mxu0  ;;  %v3198_v36 = vadd.f32 %v3197_v12, %v3089_v2 }
 0x2a5   : > { %v3199_v16 = vpop.f32.mrf.mxu1  ;;  %v3303_v58 = vadd.f32 %v3302_v25, %v3182_v1 }
 0x2a6   : > { %v3307_v8 = vpop.f32.mrf.mxu0  ;;  %v3200_v49 = vadd.f32 %v3199_v16, %v3091_v24 }
 0x2a7   : > { %v3394_v18 = vpop.f32.mrf.mxu1  ;;  %v3308_v34 = vadd.f32 %v3307_v8, %v3189_v56 }
 0x2a8   : > { %v3395_v57 = vadd.f32 %v3394_v18, %v3294_v59  ;;  %v3309_v39 = vpop.f32.mrf.mxu0 }
 0x2a9   : > { %v3396_v32 = vpop.f32.mrf.mxu1  ;;  %v3310_v38 = vadd.f32 %v3309_v39, %v3191_v0 }
 0x2aa   : > { %v3397_v4 = vadd.f32 %v3396_v32, %v3296_v3  ;;  %v3422_v43 = vadd.f32 %v3395_v57, %v5949_v45  ;;  %v3314_v60 = vpop.f32.mrf.mxu0 }
 0x2ab   : > { %v3401_v27 = vpop.f32.mrf.mxu1  ;;  %v3315_v35 = vadd.f32 %v3314_v60, %v3198_v36 }
 0x2ac   : > { %v3402_v50 = vadd.f32 %v3401_v27, %v3301_v29  ;;  %v3423_v29 = vadd.f32 %v3397_v4, %v5955_v62  ;;  %v3454_v51 = vmul.f32 0.01, %v3422_v43  ;;  %v3316_v10 = vpop.f32.mrf.mxu0  ;;  %vm3438_vm3 = vcmp.gt.f32.partialorder %v3422_v43, 0.0 }
 0x2ad   : > { %v3403_v40 = vpop.f32.mrf.mxu1 }
 0x2ae   : > { %v3426_v63 = vadd.f32 %v3402_v50, %v5971_v53  ;;  %v3404_v59 = vadd.f32 %v3403_v40, %v3303_v58  ;;  %vm3439_vm14 = vcmp.gt.f32.partialorder %v3423_v29, 0.0  ;;  %v3455_v62 = vmul.f32 0.01, %v3423_v29 }
 0x2af   : > { %v3408_v46 = vpop.f32.mrf.mxu1  ;;  %v3470_v18 = vsel %vm3438_vm3, %v3422_v43, %v3454_v51 }
 0x2b0   : > { %v3409_v55 = vadd.f32 %v3408_v46, %v3308_v34  ;;  %v3427_v32 = vadd.f32 %v3404_v59, %v5986_v14  ;;  %v3458_v42 = vmul.f32 0.01, %v3426_v63  ;;  %vm3442_vm15 = vcmp.gt.f32.partialorder %v3426_v63, 0.0 }
 0x2b1   : > { %v3410_v33 = vpop.f32.mrf.mxu1  ;;  %v3317_v14 = vadd.f32 %v3316_v10, %v3200_v49  ;;  %v6297_v3 = vand.u32 4294901760, %v3470_v18 }
 0x2b2   : > { %v3430_v45 = vadd.f32 %v3409_v55, %v5996_v31  ;;  %v3411_v28 = vadd.f32 %v3410_v33, %v3310_v38  ;;  %vm3443_vm12 = vcmp.gt.f32.partialorder %v3427_v32, 0.0  ;;  %v3459_v53 = vmul.f32 0.01, %v3427_v32 }
 0x2b3   : > { %v3415_v23 = vpop.f32.mrf.mxu1  ;;  %v3474_v16 = vsel %vm3442_vm15, %v3426_v63, %v3458_v42  ;;  %v6323_v34 = vsub.f32 %v3470_v18, %v6297_v3 }
 0x2b4   : > { %vm3446_vm13 = vcmp.gt.f32.partialorder %v3430_v45, 0.0  ;;  %v3462_v13 = vmul.f32 0.01, %v3430_v45  ;;  %v3431_v41 = vadd.f32 %v3411_v28, %v6009_v11  ;;  %v3416_v21 = vadd.f32 %v3415_v23, %v3315_v35  ;;  %v6559_v23 = vld [vmem:[#allocation46_spill] sm:$0xff] }
 0x2b5   : > { %v3417_v12 = vpop.f32.mrf.mxu1  ;;  %v3475_v25 = vsel %vm3443_vm12, %v3427_v32, %v3459_v53  ;;  %v3471_v11 = vsel %vm3439_vm14, %v3423_v29, %v3455_v62  ;;  %v6290_v57 = vand.u32 4294901760, %v3474_v16  ;;  %v4222_v55 = vand.u32 4294901760, %v6323_v34  ;;  %v6558_v53 = vld [vmem:[#allocation30_spill] sm:$0xff]  ;;  %v4788_v62 = vld [vmem:[%s4972_s11] sm:$0xff] }
 0x2b6   : > { %v3478_v5 = vsel %vm3446_vm13, %v3430_v45, %v3462_v13  ;;  %vm3447_vm0 = vcmp.gt.f32.partialorder %v3431_v41, 0.0  ;;  %v3463_v7 = vmul.f32 0.01, %v3431_v41  ;;  %v3434_v31 = vadd.f32 %v3416_v21, %v6017_v19 }
 0x2b7   : > { %v3418_v22 = vadd.f32 %v3417_v12, %v3317_v14  ;;  %v6284_v9 = vand.u32 4294901760, %v3478_v5  ;;  %v6286_v61 = vand.u32 4294901760, %v3475_v25  ;;  %v6292_v39 = vand.u32 4294901760, %v3471_v11 }
 0x2b8   : > { %v3479_v47 = vsel %vm3447_vm0, %v3431_v41, %v3463_v7  ;;  %vm3450_vm4 = vcmp.gt.f32.partialorder %v3434_v31, 0.0  ;;  %v3466_v26 = vmul.f32 0.01, %v3434_v31  ;;  %v6312_v58 = vsub.f32 %v3474_v16, %v6290_v57  ;;  %v4789_v7 = vld [vmem:[%s4972_s11 + $0x8] sm:$0xff]  ;;  %s162_s11 = sand.u32 1, %s4842_s13  }
 0x2b9   : > { %v3435_v8 = vadd.f32 %v3418_v22, %v6028_v15  ;;  %v6282_v6 = vand.u32 4294901760, %v3479_v47  ;;  %v6303_v52 = vsub.f32 %v3478_v5, %v6284_v9  ;;  %v6308_v56 = vsub.f32 %v3475_v25, %v6286_v61  ;;  %s4733_s19 = sshll.u32 %s162_s11, 2  ;;  %s4656_s29 = scalar_lea.sflag [#allocation3], %s162_s11 }
 0x2ba   : > { %v3482_v54 = vsel %vm3450_vm4, %v3434_v31, %v3466_v26  ;;  %v6318_v2 = vsub.f32 %v3471_v11, %v6292_v39  ;;  %v4210_v63 = vand.u32 4294901760, %v6312_v58  ;;  %v4223_v45 = vsub.f32 %v6323_v34, %v4222_v55  ;;  %s164_s24 = scalar_lea.vmem [#allocation2], %s4733_s19 }
 0x2bb   : > { %vm3451_vm2 = vcmp.gt.f32.partialorder %v3435_v8, 0.0  ;;  %v3467_v19 = vmul.f32 0.01, %v3435_v8  ;;  %v6288_v37 = vand.u32 4294901760, %v3482_v54  ;;  %v6295_v1 = vsub.f32 %v3479_v47, %v6282_v6  ;;  %s4670_s25 = sshll.u32 %s164_s24, 4  ;;  %s4671_s25 = int_to_ptr.vmem [resolvable:$true] %s4670_s25 }
 0x2bc   : > { %v4198_v0 = vand.u32 4294901760, %v6303_v52  ;;  %v4204_v60 = vand.u32 4294901760, %v6308_v56  ;;  %v4216_v36 = vand.u32 4294901760, %v6318_v2  ;;  %v4211_v33 = vsub.f32 %v6312_v58, %v4210_v63  ;;  %s4790_s30 = scalar_lea.vmem %s4671_s25, 64  ;;  %p4797_p0 = scmp.lt.s32.totalorder %s4671_s25, %s4795_s5 }
 0x2bd   : > { %v3483_v15 = vsel %vm3451_vm2, %v3435_v8, %v3467_v19  ;;  %v6300_v27 = vsub.f32 %v3482_v54, %v6288_v37  ;;  %v4192_v40 = vand.u32 4294901760, %v6295_v1  ;;  %v3484_v14 = vmul.f32 %v4788_v62, %v4788_v62  ;;  %v6565_v62 = vld [vmem:[#allocation43_spill] sm:$0xff]  ;;  %p4791_p11 = scmp.ne.s32.totalorder %s4671_s25, %s4790_s30  ;;  %p4798_p1 = scmp.lt.s32.totalorder %s4796_s16, %s4790_s30 }
 0x2be   : > { %v6305_v20 = vand.u32 4294901760, %v3483_v15  ;;  %v4199_v38 = vsub.f32 %v6303_v52, %v4198_v0  ;;  %v4205_v29 = vsub.f32 %v6308_v56, %v4204_v60  ;;  %v4217_v35 = vsub.f32 %v6318_v2, %v4216_v36 }
 0x2bf   : > { %v4186_v50 = vand.u32 4294901760, %v6300_v27  ;;  %v4193_v46 = vsub.f32 %v6295_v1, %v4192_v40  ;;  %v4212_v49 = vand.u32 4294901760, %v4211_v33  ;;  %v3485_v31 = vmul.f32 %v4789_v7, %v4789_v7  ;;  %v6563_v33 = vld [vmem:[#allocation26_spill] sm:$0xff]  ;;  %p4792_p12 = pnand %p4791_p11, %p4914_p5  ;;  %p4799_p2 = por %p4798_p1, %p4797_p0 }
 0x2c0   : > { %4095 = vmatprep.subr.mxu0 %v6305_v20  ;;  %v4179_v4 = vsub.f32 %v3483_v15, %v6305_v20  ;;  %v4200_v10 = vand.u32 4294901760, %v4199_v38  ;;  %v4206_v28 = vand.u32 4294901760, %v4205_v29  ;;  %v4218_v42 = vand.u32 4294901760, %v4217_v35 }
 0x2c1   : > { %4097 = vmatpush1.msra.mxu0 %v6288_v37  ;;  %v4187_v48 = vsub.f32 %v6300_v27, %v4186_v50  ;;  %v4194_v51 = vand.u32 4294901760, %v4193_v46  ;;  %v3489_v47 = vcombine.high %v3485_v31, %v3485_v31  ;;  %v3492_v8 = vsel %vm256_vm1, %v3484_v14, 0.0  ;;  %v6562_v46 = vld [vmem:[#allocation19_spill] sm:$0xff]  ;;  %p4793_p13 = pneg %p4792_p12 }
 0x2c2   : > { %4099 = vmatprep.subr.mxu0 %v6282_v6  ;;  %v4180_v43 = vand.u32 4294901760, %v4179_v4  ;;  %v3493_v18 = vrot.slane %v3492_v8, 4 }
 0x2c3   : > { %4101 = vmatpush1.msra.mxu0 %v6284_v9  ;;  %v4188_v32 = vand.u32 4294901760, %v4187_v48  ;;  %p4800_p3 = pnand %p4799_p2, %p4793_p13 }
 0x2c4   : > { %4103 = vmatprep.subr.mxu0 %v6286_v61  ;;  %v4181_v59 = vsub.f32 %v4179_v4, %v4180_v43 }
 0x2c5   : > { %4105 = vmatpush1.msra.mxu0 %v6290_v57 }
 0x2c6   : > { %4107 = vmatprep.subr.mxu0 %v6292_v39  ;;  %v4182_v24 = vand.u32 4294901760, %v4181_v59 }
 0x2c7   : > { %4109 = vmatpush1.msra.mxu0 %v6297_v3 }
 0x2c8   : > { %4183 = vmatprep.subr.mxu1 %v4182_v24  ;;  %4292 = vmatprep.subr.mxu0 %v4179_v4 }
 0x2c9   : > { %4148 = vmatmul.mubr.f32.vlgmr.msra.gmra.mxu0 %v6227_v44  ;;  %4189 = vmatpush1.msra.mxu1 %v4188_v32  ;;  %v4224_v44 = vand.u32 4294901760, %v4223_v45 }
 0x2ca   : > { %4295 = vmatpush1.msra.mxu0 %v6300_v27  ;;  %4195 = vmatprep.subr.mxu1 %v4194_v51 }
 0x2cb   : > { %4298 = vmatprep.subr.mxu0 %v6295_v1  ;;  %4201 = vmatpush1.msra.mxu1 %v4200_v10 }
 0x2cc   : > { %4301 = vmatpush1.msra.mxu0 %v6303_v52  ;;  %4207 = vmatprep.subr.mxu1 %v4206_v28 }
 0x2cd   : > { %4304 = vmatprep.subr.mxu0 %v6308_v56  ;;  %4213 = vmatpush1.msra.mxu1 %v4212_v49 }
 0x2ce   : > { %4307 = vmatpush1.msra.mxu0 %v6312_v58  ;;  %4219 = vmatprep.subr.mxu1 %v4218_v42  ;;  %v6564_v42 = vld [vmem:[#allocation29_spill] sm:$0xff] }
 0x2cf   : > { %4310 = vmatprep.subr.mxu0 %v6318_v2  ;;  %4225 = vmatpush1.msra.mxu1 %v4224_v44 }
 0x2d0   : > { %4313 = vmatpush1.msra.mxu0 %v6323_v34  ;;  %4346 = vmatprep.mubr.f32.mxu0 %v6502_v17  ;;  %v6561_v34 = vld [vmem:[#allocation16_spill] sm:$0xff] }
 0x2d1   : > { %4380 = vmatprep.subr.mxu1 %v6305_v20  ;;  %4464 = vmatprep.subr.mxu0 %v4180_v43 }
 0x2d2   : > { %4260 = vmatmul.mubr.f32.vlgmr.msra.gmra.mxu1 %v6162_v30  ;;  %4349 = vmatmul.mubr.f32.vlgmr.msra.gmra.mxu0 %v6558_v53 }
 0x2d3   : > { %4382 = vmatpush1.msra.mxu1 %v6288_v37  ;;  %4468 = vmatpush1.msra.mxu0 %v4186_v50 }
 0x2d4   : > { %4384 = vmatprep.subr.mxu1 %v6282_v6  ;;  %4472 = vmatprep.subr.mxu0 %v4192_v40 }
 0x2d5   : > { %4386 = vmatpush1.msra.mxu1 %v6284_v9  ;;  %4476 = vmatpush1.msra.mxu0 %v4198_v0  ;;  %v6560_v0 = vld [vmem:[#allocation15_spill] sm:$0xff] }
 0x2d6   : > { %4388 = vmatprep.subr.mxu1 %v6286_v61  ;;  %4480 = vmatprep.subr.mxu0 %v4204_v60  ;;  %v429_v43 = vadd.f32 %v6561_v34, %v6560_v0 }
 0x2d7   : > { %4390 = vmatpush1.msra.mxu1 %v6290_v57  ;;  %4484 = vmatpush1.msra.mxu0 %v4210_v63 }
 0x2d8   : > { %4392 = vmatprep.subr.mxu1 %v6292_v39  ;;  %4488 = vmatprep.subr.mxu0 %v4216_v36  ;;  %v567_v36 = vadd.f32 %v6562_v46, %v429_v43 }
 0x2d9   : > { %4394 = vmatpush1.msra.mxu1 %v6297_v3  ;;  %4492 = vmatpush1.msra.mxu0 %v4222_v55 }
 0x2da   : > { %4427 = vmatprep.mubr.f32.mxu1 %v6502_v17  ;;  %4558 = vmatprep.subr.mxu1 %v6305_v20  ;;  %v708_v51 = vadd.f32 %v6563_v33, %v567_v36 }
 0x2db   : > { %4431 = vmatmul.mubr.f32.vlgmr.msra.gmra.mxu1 %v6559_v23  ;;  %4525 = vmatprep.mubr.f32.mxu0 %v6502_v17 }
 0x2dc   : > { %4560 = vmatpush1.msra.mxu1 %v6288_v37  ;;  %4527 = vmatmul.mubr.f32.vlgmr.msra.gmra.mxu0 %v6162_v30  ;;  %v856_v44 = vadd.f32 %v6564_v42, %v708_v51 }
 0x2dd   : > { %4562 = vmatprep.subr.mxu1 %v6282_v6  ;;  %4605 = vmatprep.mubr.f32.mxu1 %v6502_v17  ;;  %v3488_v17 = vcombine.high %v3484_v14, %v3484_v14  ;;  %v3506_v6 = vsel %vm256_vm1, %v3485_v31, 0.0 }
 0x2de   : > { %4564 = vmatpush1.msra.mxu1 %v6284_v9  ;;  %v3513_v9 = vsel %vm256_vm1, %v3489_v47, 0.0  ;;  %v3507_v37 = vrot.slane %v3506_v6, 4  ;;  %v990_v14 = vadd.f32 %v6565_v62, %v856_v44  ;;  %v6566_v47 = vld [vmem:[#allocation51_spill] sm:$0xff] }
 0x2df   : > { %4566 = vmatprep.subr.mxu1 %v6286_v61  ;;  %v3499_v16 = vsel %vm256_vm1, %v3488_v17, 0.0 }
 0x2e0   : > { %4568 = vmatpush1.msra.mxu1 %v6290_v57  ;;  %v3508_v20 = vadd.f32 %v3507_v37, %v3506_v6 }
 0x2e1   : > { %4570 = vmatprep.subr.mxu1 %v6292_v39  ;;  %v3514_v39 = vrot.slane %v3513_v9, 4 }
 0x2e2   : > { %4572 = vmatpush1.msra.mxu1 %v6297_v3  ;;  %v3494_v3 = vadd.f32 %v3493_v18, %v3492_v8  ;;  %v3509_v48 = vrot.slane %v3508_v20, 2 }
 0x2e3   : > { %4607 = vmatmul.mubr.f32.vlgmr.msra.gmra.mxu1 %v6162_v30  ;;  %v3500_v30 = vrot.slane %v3499_v16, 4  ;;  %v3515_v50 = vadd.f32 %v3514_v39, %v3513_v9 }
 0x2e4   : > { %v3495_v2 = vrot.slane %v3494_v3, 2  ;;  %v3510_v10 = vadd.f32 %v3509_v48, %v3508_v20  ;;  %v6571_v48 = vld [vmem:[#allocation53_spill] sm:$0xff] }
 0x2e5   : > { %v3501_v19 = vadd.f32 %v3500_v30, %v3499_v16  ;;  %v3516_v59 = vrot.slane %v3515_v50, 2 }
 0x2e6   : > { %v3496_v29 = vadd.f32 %v3495_v2, %v3494_v3  ;;  %v3511_v7 = vrot.slane %v3510_v10, 1  ;;  %v6568_v3 = vld [vmem:[#allocation31_spill] sm:$0xff] }
 0x2e7   : > { %v3502_v27 = vrot.slane %v3501_v19, 2  ;;  %v3517_v49 = vadd.f32 %v3516_v59, %v3515_v50 }
 0x2e8   : > { %v3512_v18 = vadd.f32 %v3511_v7, %v3510_v10 }
 0x2e9   : > { %v3503_v60 = vadd.f32 %v3502_v27, %v3501_v19  ;;  %v3518_v16 = vrot.slane %v3517_v49, 1  ;;  %v4630_v19 = vlaneseq }
 0x2ea   : > { %v3522_v2 = vmul.f32 0.01, %v3512_v18 }
 0x2eb   : > { %v3504_v35 = vrot.slane %v3503_v60, 1  ;;  %v4631_v43 = vshrl.u32 %v4630_v19, 7  ;;  %vm4652_vm1 = vcmp.lt.s32.totalorder %v4630_v19, 512 }
 0x31c   : > { %v3606_v13 = vpop.f32.mrf.mxu0 }
 0x31e   : > { %v3608_v41 = vpop.f32.mrf.mxu0 }
 0x325   : > { %v3718_v21 = vpop.f32.mrf.mxu1  ;;  %v3807_v5 = vpop.f32.mrf.mxu0 }
 0x326   : > { %v3719_v15 = vadd.f32 %v3718_v21, %v3606_v13 }
 0x327   : > { %v3720_v12 = vpop.f32.mrf.mxu1  ;;  %v3809_v25 = vpop.f32.mrf.mxu0 }
 0x328   : > { %v3721_v57 = vadd.f32 %v3720_v12, %v3608_v41  ;;  %v3808_v40 = vadd.f32 %v3807_v5, %v3719_v15  ;;  %v3497_v41 = vrot.slane %v3496_v29, 1  ;;  %v3505_v12 = vadd.f32 %v3504_v35, %v3503_v60  ;;  %v6567_v15 = vld [vmem:[#allocation52_spill] sm:$0xff] }
 0x329   : > { %v1847_v27 = vadd.f32 %v6568_v3, %v6567_v15 }
 0x32a   : > { %v3810_v56 = vadd.f32 %v3809_v25, %v3721_v57  ;;  %v3498_v8 = vadd.f32 %v3497_v41, %v3496_v29  ;;  %v3521_v37 = vmul.f32 0.01, %v3505_v12 }
 0x32c   : > { %v3520_v20 = vmul.f32 0.01, %v3498_v8 }
 0x32e   : > { %v3889_v22 = vpop.f32.mrf.mxu1 }
 0x32f   : > { %v3985_v11 = vpop.f32.mrf.mxu0  ;;  %v3890_v24 = vadd.f32 %v3889_v22, %v3808_v40 }
 0x330   : > { %v3891_v26 = vpop.f32.mrf.mxu1 }
 0x331   : > { %v3987_v54 = vpop.f32.mrf.mxu0  ;;  %v3892_v63 = vadd.f32 %v3891_v26, %v3810_v56  ;;  %v3986_v13 = vadd.f32 %v3985_v11, %v3890_v24  ;;  %v1120_v26 = vadd.f32 %v6566_v47, %v990_v14  ;;  %v4854_v11 = vmov 1966171168   ;;  %v6569_v56 = vld [vmem:[#allocation50_spill] sm:$0xff] }
 0x333   : > { %v3988_v45 = vadd.f32 %v3987_v54, %v3892_v63  ;;  %v4628_v54 = vunpack.c.l.s4 %v4854_v11 }
 0x335   : > { %v4629_v34 = vunpack.c.0.s8 %v4628_v54 }
 0x336   : > { %v4065_v61 = vpop.f32.mrf.mxu1 }
 0x337   : > { %v4066_v30 = vadd.f32 %v4065_v61, %v3986_v13 }
 0x338   : > { %v4067_v52 = vpop.f32.mrf.mxu1 }
 0x339   : > { %v4068_v31 = vadd.f32 %v4067_v52, %v3988_v45  ;;  %v4613_v50 = vadd.f32 %v4066_v30, %v6569_v56 }
 0x33b   : > { %v4614_v57 = vadd.f32 %v4068_v31, %v1120_v26  ;;  %v4617_v36 = vadd.f32 %v4613_v50, %v3520_v20 }
 0x33d   : > { %v4618_v60 = vadd.f32 %v4614_v57, %v3521_v37 }
 0x389   : > { %v4149_v1 = vpop.f32.mrf.mxu0 }
 0x38b   : > { %v4151_v58 = vpop.f32.mrf.mxu0 }
 0x392   : > { %v4261_v4 = vpop.f32.mrf.mxu1  ;;  %v4350_v55 = vpop.f32.mrf.mxu0 }
 0x393   : > { %v4262_v32 = vadd.f32 %v4261_v4, %v4149_v1  ;;  %v3519_v1 = vadd.f32 %v3518_v16, %v3517_v49  ;;  %v6570_v4 = vld [vmem:[#allocation41_spill] sm:$0xff] }
 0x394   : > { %v4263_v38 = vpop.f32.mrf.mxu1  ;;  %v4352_v53 = vpop.f32.mrf.mxu0  ;;  %v1977_v40 = vadd.f32 %v6570_v4, %v1847_v27 }
 0x395   : > { %v4264_v28 = vadd.f32 %v4263_v38, %v4151_v58  ;;  %v4351_v21 = vadd.f32 %v4350_v55, %v4262_v32  ;;  %v3523_v59 = vmul.f32 0.01, %v3519_v1  ;;  %v4625_v55 = vcombine.low %v4617_v36, %v4618_v60 }
 0x396   : > { %v4632_v32 = vsub.s32 %v4629_v34, %v4631_v43 }
 0x397   : > { %v4353_v25 = vadd.f32 %v4352_v53, %v4264_v28 }
 0x398   : > { %v4633_v51 = vrot.slane %v4625_v55, %v4632_v32 }
 0x39b   : > { %v4432_v23 = vpop.f32.mrf.mxu1 }
 0x39c   : > { %v4528_v17 = vpop.f32.mrf.mxu0  ;;  %v4433_v22 = vadd.f32 %v4432_v23, %v4351_v21 }
 0x39d   : > { %v4434_v5 = vpop.f32.mrf.mxu1 }
 0x39e   : > { %v4435_v6 = vadd.f32 %v4434_v5, %v4353_v25  ;;  %v4530_v9 = vpop.f32.mrf.mxu0  ;;  %v4529_v39 = vadd.f32 %v4528_v17, %v4433_v22 }
 0x3a0   : > { %v4531_v58 = vadd.f32 %v4530_v9, %v4435_v6 }
 0x3a3   : > { %v4608_v52 = vpop.f32.mrf.mxu1 }
 0x3a4   : > { %v4609_v61 = vadd.f32 %v4608_v52, %v4529_v39 }
 0x3a5   : > { %v4610_v0 = vpop.f32.mrf.mxu1 }
 0x3a6   : > { %v4615_v63 = vadd.f32 %v4609_v61, %v6571_v48  ;;  %v4611_v46 = vadd.f32 %v4610_v0, %v4531_v58 }
 0x3a8   : > { %v4616_v38 = vadd.f32 %v4611_v46, %v1977_v40  ;;  %v4619_v24 = vadd.f32 %v4615_v63, %v3522_v2 }
 0x3aa   : > { %v4620_v29 = vadd.f32 %v4616_v38, %v3523_v59 }
 0x3ac   : > { %v4626_v33 = vcombine.low %v4619_v24, %v4620_v29 }
 0x3ae   : > { %v4640_v35 = vrot.slane %v4626_v33, %v4632_v32 }
 0x3b0   : > { %v4641_v10 = vcombine.low %v4633_v51, %v4640_v35 }
 0x3b2   : > { %v4648_v45 = vrot.slane %v4641_v10, %v4632_v32 }
 0x3b4   : > { %4654 = vst.msk [vmem:[%s164_s24] sm:$0xf] %vm4652_vm1, %v4648_v45 }
 0x3b5   : > { %4803 = shalt.err (!%p4800_p3)
}
 0x3b6   : > { %s4804_s6 = scalar_lea.hbm %s4668_s28, 64  ;;  %s4808_s9 = scalar_lea.hbm %s6430_s3, 128 }
 0x3b7   : > { %p4805_p4 = scmp.ne.s32.totalorder %s4668_s28, %s4804_s6  ;;  %p4809_p9 = scmp.lt.s32.totalorder %s4668_s28, %s6430_s3 }
 0x3b8   : > { %p4810_p10 = scmp.lt.s32.totalorder %s4808_s9, %s4804_s6 }
 0x3b9   : > { %p4806_p7 = pnand %p4805_p4, %p4914_p5 }
 0x3ba   : > { %p4811_p11 = por %p4810_p10, %p4809_p9 }
 0x3bb   : > { %p4807_p8 = pneg %p4806_p7 }
 0x3bd   : > { %p4812_p12 = pnand %p4811_p11, %p4807_p8 }
 0x3bf   : > { %4815 = shalt.err (!%p4812_p12)
}
 0x3c0   : > { %4742 = dma.vmem_to_hbm [thread:$0]  (%p4914_p5), %s4671_s25, 64, %s4668_s28, %s4656_s29  }
 0x3c1 PF: > { %p4748_p13 = scmp.ge.s32.totalorder %s4850_s15, 2  ;;  %s4682_s11 = sand.u32 1, %s4838_s12  }
 0x3c2   : > { %s4683_s19 = scalar_lea.sflag [#allocation3], %s4682_s11 }
 0x3c3   : > { %p4745_p0 = pnand %p4748_p13, %p4918_p6 }
 0x3c5   : > { %p4746_p1 = pneg %p4745_p0 }
 0x3c7   : > { %4833 = dma.done.wait (%p4746_p1), %s4683_s19, 64  }
 0x3c8   : > { %4835 = vsyncadd (%p4746_p1), %s4683_s19, 4294967232  ;;  %p13_p2 = scmp.ge.s32.totalorder %s4901_s18, 4   ;;  %s6572_s12 = smov %s4842_s13 }
 0x3c9   : > { %s6573_s13 = smov %s4846_s14  ;;  %s6574_s14 = smov %s4912_s21 }
 0x3ca   : > { %s6575_s15 = smov %s4901_s18  ;;  %15 = sbr.rel (!%p13_p2) target bundleno = 3 (0x3), region = 67 }
 0x3cf   :  { %4688 = vsyncpa [#allocation3], 1 }
 0x3d0   :  { %4690 = vsyncpa [#allocation3 + $0x1], 1 }

</bundles_post_ra>
